<compile_context>
chip_gen: v7x
topology: tpu7x:2x2x1
jax: 0.10.0
libtpu: 0.0.40
codegen_flags: <defaults>
</compile_context>

<pallas_src>
import math
import functools

import jax
import jax.numpy as jnp
import numpy as np
from jax.experimental import pallas as pl
from jax.experimental.pallas import tpu as pltpu

# ----- synthetic "config" (cfg.num_chn, cfg.step_len * cfg.samp_rate, ...) -----
NUM_CHN = 3
STEP_LEN = 8                      # samples per step = step_len_sec * samp_rate
INPUT_SIZE = NUM_CHN * STEP_LEN   # 24
HIDDEN = 32                       # cfg.rnn_hidden_size
NUM_LAYERS = 2                    # cfg.num_rnn_layers
NUM_CLASSES = 3
BATCH = 2
SEQ = 8
ROW_PAD = 8                       # sublane group: rows per time step inside kernel

_vmem_spec = functools.partial(pl.BlockSpec, memory_space=pltpu.MemorySpace.VMEM)


# --------------------------- fused Pallas kernel ------------------------------
def _ppknet_kernel(xcat_ref,                                  # (T*8, 2*D0)  [x(t) | x(T-1-t)]
                   w0_ref, b0_ref, whh0_ref, bhhn0_ref,       # layer0 packed
                   wA1_ref, wB1_ref, b1_ref, whh1_ref, bhhn1_ref,  # layer1 packed
                   fcwa_ref, fcwb_ref, fcb_ref,               # FC head packed
                   out_ref,                                   # (T*8, C)
                   gi_ref, z_ref, zr_ref,                     # scratch: (T*8,6H),(T*8,2H),(T*8,2H)
                   *, T, H):
    """Entire PpkNet forward in one kernel.

    Combined gate-column layout (6H lanes):
        [ r_f | r_b | z_f | z_b | n_f | n_b ]
    Composite hidden state hh = [h_f(t) | h_b(T-1-t)]  (8 x 2H).
    Z[t]     = hh after step t          -> [ yf(t)     | yb(T-1-t) ]
    Z_rev[t] = Z[T-1-t]                 -> [ yf(T-1-t) | yb(t)     ]
    """
    RP = ROW_PAD
    H2, H4 = 2 * H, 4 * H

    def run_layer(whh_c, bhh_n):
        # whh_c: (2H, 6H) block-diagonal hidden weights; bhh_n: (RP, 2H) broadcast.
        hh = jnp.zeros((RP, H2), jnp.float32)
        for t in range(T):                         # T=8: fully unrolled
            gi = gi_ref[t * RP:(t + 1) * RP, :]    # (RP, 6H), sublane-aligned load
            gh = jnp.dot(hh, whh_c, preferred_element_type=jnp.float32)
            # one sigmoid over the full 128-lane r|z block
            rz = jax.nn.sigmoid(gi[:, 0:H4] + gh[:, 0:H4])
            r = rz[:, 0:H2]                        # [r_f | r_b]
            z = rz[:, H2:H4]                       # [z_f | z_b]
            n = jnp.tanh(gi[:, H4:] + r * (gh[:, H4:] + bhh_n))
            hh = n + z * (hh - n)                  # == (1-z)*n + z*h
            z_ref[t * RP:(t + 1) * RP, :] = hh               # Z[t]
            zr_ref[(T - 1 - t) * RP:(T - t) * RP, :] = hh    # Z_rev[T-1-t]

    # ---------------- layer 0: hoisted input projection ----------------
    gi_ref[...] = (jnp.dot(xcat_ref[...], w0_ref[...],
                           preferred_element_type=jnp.float32) + b0_ref[...])
    run_layer(whh0_ref[...], jnp.broadcast_to(bhhn0_ref[...], (RP, H2)))

    # ---------------- layer 1: hoisted input projection from Z / Z_rev -------
    gi_ref[...] = (jnp.dot(z_ref[...], wA1_ref[...], preferred_element_type=jnp.float32)
                   + jnp.dot(zr_ref[...], wB1_ref[...], preferred_element_type=jnp.float32)
                   + b1_ref[...])
    run_layer(whh1_ref[...], jnp.broadcast_to(bhhn1_ref[...], (RP, H2)))

    # ---------------- FC head (fused epilogue) ----------------
    out_ref[...] = (jnp.dot(z_ref[...], fcwa_ref[...], preferred_element_type=jnp.float32)
                    + jnp.dot(zr_ref[...], fcwb_ref[...], preferred_element_type=jnp.float32)
                    + fcb_ref[...])


# --------------------------- wrapper -------------------------------------------
@jax.jit
def ppknet_forward(x, kp):
    """x: (B, T, INPUT_SIZE)  ->  (B, T, NUM_CLASSES)."""
    B, T, D = x.shape
    H = HIDDEN
    RP = ROW_PAD

    # Pad batch rows 2 -> 8 (sublane group) and build [x(t) | x(T-1-t)] rows.
    x_t = jnp.transpose(x, (1, 0, 2))                                  # (T, B, D)
    x_pad = jnp.zeros((T, RP, D), jnp.float32).at[:, :B, :].set(x_t)   # (T, 8, D)
    x_rev = x_pad[::-1]
    xcat = jnp.concatenate([x_pad, x_rev], axis=-1).reshape(T * RP, 2 * D)

    kernel = functools.partial(_ppknet_kernel, T=T, H=H)
    out2d = pl.pallas_call(
        kernel,
        out_shape=jax.ShapeDtypeStruct((T * RP, NUM_CLASSES), jnp.float32),
        in_specs=[_vmem_spec()] * 13,
        out_specs=_vmem_spec(),
        scratch_shapes=[pltpu.VMEM((T * RP, 6 * H), jnp.float32),   # GI (reused per layer)
                        pltpu.VMEM((T * RP, 2 * H), jnp.float32),   # Z
                        pltpu.VMEM((T * RP, 2 * H), jnp.float32)],  # Z_rev
    )(xcat,
      kp["w0"], kp["b0"], kp["whh0"], kp["bhhn0"],
      kp["wA1"], kp["wB1"], kp["b1"], kp["whh1"], kp["bhhn1"],
      kp["fcwa"], kp["fcwb"], kp["fcb"])

    out = out2d.reshape(T, RP, NUM_CLASSES)[:, :B, :]
    return jnp.transpose(out, (1, 0, 2))


# --------------------------- params (natural layout) ----------------------------
def init_params(key):
    """Natural merged-gate layout. dir 0 = forward, 1 = backward; gate order [r,z,n]."""
    H = HIDDEN
    k = 1.0 / math.sqrt(H)
    kf = 1.0 / math.sqrt(2 * H)
    keys = jax.random.split(key, 10)
    u = lambda kk, shape, lim: jax.random.uniform(kk, shape, jnp.float32, -lim, lim)
    return {
        "wih0": u(keys[0], (2, INPUT_SIZE, 3 * H), k),
        "whh0": u(keys[1], (2, H, 3 * H), k),
        "bih0": u(keys[2], (2, 1, 3 * H), k),
        "bhh0": u(keys[3], (2, 1, 3 * H), k),
        "wih1": u(keys[4], (2, 2 * H, 3 * H), k),
        "whh1": u(keys[5], (2, H, 3 * H), k),
        "bih1": u(keys[6], (2, 1, 3 * H), k),
        "bhh1": u(keys[7], (2, 1, 3 * H), k),
        "fcw": u(keys[8], (2 * H, NUM_CLASSES), kf),
        "fcb": u(keys[9], (1, NUM_CLASSES), kf),
    }


# --------------------------- packing to kernel layout ----------------------------
def pack_params(p):
    """Pack natural per-direction weights into the kernel's combined layouts."""
    H = HIDDEN
    C = NUM_CLASSES

    def place_f(w):   # (D,3H)[r,z,n] -> (D,6H) forward slots [0:H],[2H:3H],[4H:5H]
        D = w.shape[0]
        o = jnp.zeros((D, 6 * H), jnp.float32)
        o = o.at[:, 0:H].set(w[:, 0:H])
        o = o.at[:, 2 * H:3 * H].set(w[:, H:2 * H])
        o = o.at[:, 4 * H:5 * H].set(w[:, 2 * H:3 * H])
        return o

    def place_b(w):   # backward slots [H:2H],[3H:4H],[5H:6H]
        D = w.shape[0]
        o = jnp.zeros((D, 6 * H), jnp.float32)
        o = o.at[:, H:2 * H].set(w[:, 0:H])
        o = o.at[:, 3 * H:4 * H].set(w[:, H:2 * H])
        o = o.at[:, 5 * H:6 * H].set(w[:, 2 * H:3 * H])
        return o

    def rz_only(b):   # keep r,z bias, zero the n part (n's b_hh stays in the loop)
        return b.at[:, 2 * H:3 * H].set(jnp.zeros((b.shape[0], H), jnp.float32))

    def layer_pack(whh, bih, bhh):
        whh_c = jnp.concatenate([place_f(whh[0]), place_b(whh[1])], axis=0)   # (2H,6H)
        b_c = (place_f(bih[0]) + place_b(bih[1])
               + place_f(rz_only(bhh[0])) + place_b(rz_only(bhh[1])))         # (1,6H)
        bhh_n = jnp.concatenate([bhh[0][:, 2 * H:], bhh[1][:, 2 * H:]], axis=1)  # (1,2H)
        return whh_c, b_c, bhh_n

    whh0c, b0c, bhhn0 = layer_pack(p["whh0"], p["bih0"], p["bhh0"])
    whh1c, b1c, bhhn1 = layer_pack(p["whh1"], p["bih1"], p["bhh1"])

    # layer-0 input weights against xcat = [x(t) | x(T-1-t)]
    w0 = jnp.concatenate([place_f(p["wih0"][0]), place_b(p["wih0"][1])], axis=0)  # (2D0,6H)

    # layer-1 input weights against composite Z / Z_rev buffers
    w1f, w1b = p["wih1"][0], p["wih1"][1]                       # each (2H, 3H)
    wA1 = jnp.concatenate([place_f(w1f[:H]), place_b(w1b[H:])], axis=0)   # (2H,6H)
    wB1 = jnp.concatenate([place_b(w1b[:H]), place_f(w1f[H:])], axis=0)   # (2H,6H)

    # FC head split against Z1 / Z1_rev
    zpad = jnp.zeros((H, C), jnp.float32)
    fcwa = jnp.concatenate([p["fcw"][:H], zpad], axis=0)        # acts on Z1[:, :H]   = yf1(t)
    fcwb = jnp.concatenate([zpad, p["fcw"][H:]], axis=0)        # acts on Zrev[:, H:] = yb1(t)

    return {"w0": w0, "b0": b0c, "whh0": whh0c, "bhhn0": bhhn0,
            "wA1": wA1, "wB1": wB1, "b1": b1c, "whh1": whh1c, "bhhn1": bhhn1,
            "fcwa": fcwa, "fcwb": fcwb, "fcb": p["fcb"]}


# --------------------------- pure-JAX reference ---------------------------------
def _gru_dir_ref(x_tbd, w_ih, w_hh, b_ih, b_hh):
    """Single-direction GRU, merged-gate layout [r,z,n]. x_tbd: (T, B, D)."""
    T, B, _ = x_tbd.shape
    H = HIDDEN
    h = jnp.zeros((B, H), jnp.float32)
    outs = []
    for t in range(T):
        gi = x_tbd[t] @ w_ih + b_ih
        gh = h @ w_hh + b_hh
        r = jax.nn.sigmoid(gi[:, :H] + gh[:, :H])
        z = jax.nn.sigmoid(gi[:, H:2 * H] + gh[:, H:2 * H])
        n = jnp.tanh(gi[:, 2 * H:] + r * gh[:, 2 * H:])
        h = (1.0 - z) * n + z * h
        outs.append(h)
    return jnp.stack(outs, axis=0)


def ppknet_ref(x, p):
    h = jnp.transpose(x, (1, 0, 2))                 # (T, B, D)
    for l in range(NUM_LAYERS):
        wih, whh = p[f"wih{l}"], p[f"whh{l}"]
        bih, bhh = p[f"bih{l}"], p[f"bhh{l}"]
        of = _gru_dir_ref(h, wih[0], whh[0], bih[0], bhh[0])
        ob = _gru_dir_ref(h[::-1], wih[1], whh[1], bih[1], bhh[1])[::-1]
        h = jnp.concatenate([of, ob], axis=-1)
    y = h @ p["fcw"] + p["fcb"]                     # (T, B, C)
    return jnp.transpose(y, (1, 0, 2))


# --------------------------- main ----------------------------------------------
if __name__ == "__main__":
    key = jax.random.PRNGKey(0)
    key, kx, kp_key = jax.random.split(key, 3)
    x = jax.random.normal(kx, (BATCH, SEQ, INPUT_SIZE), jnp.float32)
    params = init_params(kp_key)
    packed = pack_params(params)

    out = jax.block_until_ready(ppknet_forward(x, packed))
    assert out.shape == (BATCH, SEQ, NUM_CLASSES), out.shape

    ref = jax.block_until_ready(ppknet_ref(x, params))
    np.testing.assert_allclose(np.asarray(out), np.asarray(ref), atol=5e-3, rtol=5e-3)

    print("KERNEL_OK")
</pallas_src>

<mosaic_0001>
module attributes {stable_mosaic.version = 11 : i64} {
  func.func @_ppknet_kernel(%arg0: memref<64x48xf32, #tpu.memory_space<vmem>>, %arg1: memref<48x192xf32, #tpu.memory_space<vmem>>, %arg2: memref<1x192xf32, #tpu.memory_space<vmem>>, %arg3: memref<64x192xf32, #tpu.memory_space<vmem>>, %arg4: memref<1x64xf32, #tpu.memory_space<vmem>>, %arg5: memref<64x192xf32, #tpu.memory_space<vmem>>, %arg6: memref<64x192xf32, #tpu.memory_space<vmem>>, %arg7: memref<1x192xf32, #tpu.memory_space<vmem>>, %arg8: memref<64x192xf32, #tpu.memory_space<vmem>>, %arg9: memref<1x64xf32, #tpu.memory_space<vmem>>, %arg10: memref<64x3xf32, #tpu.memory_space<vmem>>, %arg11: memref<64x3xf32, #tpu.memory_space<vmem>>, %arg12: memref<1x3xf32, #tpu.memory_space<vmem>>, %arg13: memref<64x3xf32, #tpu.memory_space<vmem>>, %arg14: memref<64x192xf32, #tpu.memory_space<vmem>>, %arg15: memref<64x64xf32, #tpu.memory_space<vmem>>, %arg16: memref<64x64xf32, #tpu.memory_space<vmem>>) attributes {dimension_semantics = [], scalar_prefetch = 0 : i64, scratch_operands = 3 : i64, tpu.core_type = #tpu.core_type<tc>} {
    %c0 = arith.constant 0 : index
    %c0_0 = arith.constant 0 : index
    %0 = vector.load %arg0[%c0, %c0_0] : memref<64x48xf32, #tpu.memory_space<vmem>>, vector<64x48xf32>
    %c0_1 = arith.constant 0 : index
    %c0_2 = arith.constant 0 : index
    %1 = vector.load %arg1[%c0_1, %c0_2] : memref<48x192xf32, #tpu.memory_space<vmem>>, vector<48x192xf32>
    %cst = arith.constant dense<0.000000e+00> : vector<64x192xf32>
    %2 = tpu.matmul %0, %1, %cst {dimension_numbers = #tpu.dot_dimension_numbers<[1], [0], [0], [1], [0, 0, 1, 1], [], []>} : vector<64x48xf32>, vector<48x192xf32>, vector<64x192xf32> -> vector<64x192xf32>
    %c0_3 = arith.constant 0 : index
    %c0_4 = arith.constant 0 : index
    %3 = vector.load %arg2[%c0_3, %c0_4] : memref<1x192xf32, #tpu.memory_space<vmem>>, vector<1x192xf32>
    %4 = vector.broadcast %3 : vector<1x192xf32> to vector<64x192xf32>
    %5 = arith.addf %2, %4 : vector<64x192xf32>
    %c0_5 = arith.constant 0 : index
    %c0_6 = arith.constant 0 : index
    %6 = vector.load %arg14[%c0_5, %c0_6] : memref<64x192xf32, #tpu.memory_space<vmem>>, vector<64x192xf32>
    tpu.vector_store %arg14[%c0_5, %c0_6], %5 {strides = array<i32>} : memref<64x192xf32, #tpu.memory_space<vmem>>, vector<64x192xf32>,
    %c0_7 = arith.constant 0 : index
    %c0_8 = arith.constant 0 : index
    %7 = vector.load %arg3[%c0_7, %c0_8] : memref<64x192xf32, #tpu.memory_space<vmem>>, vector<64x192xf32>
    %c0_9 = arith.constant 0 : index
    %c0_10 = arith.constant 0 : index
    %8 = vector.load %arg4[%c0_9, %c0_10] : memref<1x64xf32, #tpu.memory_space<vmem>>, vector<1x64xf32>
    %9 = vector.shape_cast %8 : vector<1x64xf32> to vector<1x64xf32>
    %10 = vector.broadcast %9 : vector<1x64xf32> to vector<8x64xf32>
    %cst_11 = arith.constant 0.000000e+00 : f32
    %11 = vector.broadcast %cst_11 : f32 to vector<8x64xf32>
    %c0_12 = arith.constant 0 : index
    %c0_13 = arith.constant 0 : index
    %12 = vector.load %arg14[%c0_12, %c0_13] : memref<64x192xf32, #tpu.memory_space<vmem>>, vector<8x192xf32>
    %cst_14 = arith.constant dense<0.000000e+00> : vector<8x192xf32>
    %13 = tpu.matmul %11, %7, %cst_14 {dimension_numbers = #tpu.dot_dimension_numbers<[1], [0], [0], [1], [0, 0, 1, 1], [], []>} : vector<8x64xf32>, vector<64x192xf32>, vector<8x192xf32> -> vector<8x192xf32>
    %14 = vector.extract_strided_slice %12 {offsets = [0, 0], sizes = [8, 128], strides = [1, 1]} : vector<8x192xf32> to vector<8x128xf32>
    %15 = vector.extract_strided_slice %13 {offsets = [0, 0], sizes = [8, 128], strides = [1, 1]} : vector<8x192xf32> to vector<8x128xf32>
    %16 = arith.addf %14, %15 : vector<8x128xf32>
    %17 = arith.negf %16 : vector<8x128xf32>
    %18 = math.exp %17 : vector<8x128xf32>
    %cst_15 = arith.constant 1.000000e+00 : f32
    %19 = vector.broadcast %cst_15 : f32 to vector<8x128xf32>
    %20 = arith.addf %19, %18 : vector<8x128xf32>
    %21 = arith.divf %19, %20 : vector<8x128xf32>
    %22 = vector.extract_strided_slice %21 {offsets = [0, 0], sizes = [8, 64], strides = [1, 1]} : vector<8x128xf32> to vector<8x64xf32>
    %23 = vector.extract_strided_slice %21 {offsets = [0, 64], sizes = [8, 64], strides = [1, 1]} : vector<8x128xf32> to vector<8x64xf32>
    %24 = vector.extract_strided_slice %12 {offsets = [0, 128], sizes = [8, 64], strides = [1, 1]} : vector<8x192xf32> to vector<8x64xf32>
    %25 = vector.extract_strided_slice %13 {offsets = [0, 128], sizes = [8, 64], strides = [1, 1]} : vector<8x192xf32> to vector<8x64xf32>
    %26 = arith.addf %25, %10 : vector<8x64xf32>
    %27 = arith.mulf %22, %26 : vector<8x64xf32>
    %28 = arith.addf %24, %27 : vector<8x64xf32>
    %29 = math.tanh %28 : vector<8x64xf32>
    %30 = arith.subf %11, %29 : vector<8x64xf32>
    %31 = arith.mulf %23, %30 : vector<8x64xf32>
    %32 = arith.addf %29, %31 : vector<8x64xf32>
    %c0_16 = arith.constant 0 : index
    %c0_17 = arith.constant 0 : index
    %33 = vector.load %arg15[%c0_16, %c0_17] : memref<64x64xf32, #tpu.memory_space<vmem>>, vector<8x64xf32>
    tpu.vector_store %arg15[%c0_16, %c0_17], %32 {strides = array<i32>} : memref<64x64xf32, #tpu.memory_space<vmem>>, vector<8x64xf32>,
    %c56 = arith.constant 56 : index
    %c0_18 = arith.constant 0 : index
    %34 = vector.load %arg16[%c56, %c0_18] : memref<64x64xf32, #tpu.memory_space<vmem>>, vector<8x64xf32>
    tpu.vector_store %arg16[%c56, %c0_18], %32 {strides = array<i32>} : memref<64x64xf32, #tpu.memory_space<vmem>>, vector<8x64xf32>,
    %c8 = arith.constant 8 : index
    %c0_19 = arith.constant 0 : index
    %35 = vector.load %arg14[%c8, %c0_19] : memref<64x192xf32, #tpu.memory_space<vmem>>, vector<8x192xf32>
    %cst_20 = arith.constant dense<0.000000e+00> : vector<8x192xf32>
    %36 = tpu.matmul %32, %7, %cst_20 {dimension_numbers = #tpu.dot_dimension_numbers<[1], [0], [0], [1], [0, 0, 1, 1], [], []>} : vector<8x64xf32>, vector<64x192xf32>, vector<8x192xf32> -> vector<8x192xf32>
    %37 = vector.extract_strided_slice %35 {offsets = [0, 0], sizes = [8, 128], strides = [1, 1]} : vector<8x192xf32> to vector<8x128xf32>
    %38 = vector.extract_strided_slice %36 {offsets = [0, 0], sizes = [8, 128], strides = [1, 1]} : vector<8x192xf32> to vector<8x128xf32>
    %39 = arith.addf %37, %38 : vector<8x128xf32>
    %40 = arith.negf %39 : vector<8x128xf32>
    %41 = math.exp %40 : vector<8x128xf32>
    %cst_21 = arith.constant 1.000000e+00 : f32
    %42 = vector.broadcast %cst_21 : f32 to vector<8x128xf32>
    %43 = arith.addf %42, %41 : vector<8x128xf32>
    %44 = arith.divf %42, %43 : vector<8x128xf32>
    %45 = vector.extract_strided_slice %44 {offsets = [0, 0], sizes = [8, 64], strides = [1, 1]} : vector<8x128xf32> to vector<8x64xf32>
    %46 = vector.extract_strided_slice %44 {offsets = [0, 64], sizes = [8, 64], strides = [1, 1]} : vector<8x128xf32> to vector<8x64xf32>
    %47 = vector.extract_strided_slice %35 {offsets = [0, 128], sizes = [8, 64], strides = [1, 1]} : vector<8x192xf32> to vector<8x64xf32>
    %48 = vector.extract_strided_slice %36 {offsets = [0, 128], sizes = [8, 64], strides = [1, 1]} : vector<8x192xf32> to vector<8x64xf32>
    %49 = arith.addf %48, %10 : vector<8x64xf32>
    %50 = arith.mulf %45, %49 : vector<8x64xf32>
    %51 = arith.addf %47, %50 : vector<8x64xf32>
    %52 = math.tanh %51 : vector<8x64xf32>
    %53 = arith.subf %32, %52 : vector<8x64xf32>
    %54 = arith.mulf %46, %53 : vector<8x64xf32>
    %55 = arith.addf %52, %54 : vector<8x64xf32>
    %c8_22 = arith.constant 8 : index
    %c0_23 = arith.constant 0 : index
    %56 = vector.load %arg15[%c8_22, %c0_23] : memref<64x64xf32, #tpu.memory_space<vmem>>, vector<8x64xf32>
    tpu.vector_store %arg15[%c8_22, %c0_23], %55 {strides = array<i32>} : memref<64x64xf32, #tpu.memory_space<vmem>>, vector<8x64xf32>,
    %c48 = arith.constant 48 : index
    %c0_24 = arith.constant 0 : index
    %57 = vector.load %arg16[%c48, %c0_24] : memref<64x64xf32, #tpu.memory_space<vmem>>, vector<8x64xf32>
    tpu.vector_store %arg16[%c48, %c0_24], %55 {strides = array<i32>} : memref<64x64xf32, #tpu.memory_space<vmem>>, vector<8x64xf32>,
    %c16 = arith.constant 16 : index
    %c0_25 = arith.constant 0 : index
    %58 = vector.load %arg14[%c16, %c0_25] : memref<64x192xf32, #tpu.memory_space<vmem>>, vector<8x192xf32>
    %cst_26 = arith.constant dense<0.000000e+00> : vector<8x192xf32>
    %59 = tpu.matmul %55, %7, %cst_26 {dimension_numbers = #tpu.dot_dimension_numbers<[1], [0], [0], [1], [0, 0, 1, 1], [], []>} : vector<8x64xf32>, vector<64x192xf32>, vector<8x192xf32> -> vector<8x192xf32>
    %60 = vector.extract_strided_slice %58 {offsets = [0, 0], sizes = [8, 128], strides = [1, 1]} : vector<8x192xf32> to vector<8x128xf32>
    %61 = vector.extract_strided_slice %59 {offsets = [0, 0], sizes = [8, 128], strides = [1, 1]} : vector<8x192xf32> to vector<8x128xf32>
    %62 = arith.addf %60, %61 : vector<8x128xf32>
    %63 = arith.negf %62 : vector<8x128xf32>
    %64 = math.exp %63 : vector<8x128xf32>
    %cst_27 = arith.constant 1.000000e+00 : f32
    %65 = vector.broadcast %cst_27 : f32 to vector<8x128xf32>
    %66 = arith.addf %65, %64 : vector<8x128xf32>
    %67 = arith.divf %65, %66 : vector<8x128xf32>
    %68 = vector.extract_strided_slice %67 {offsets = [0, 0], sizes = [8, 64], strides = [1, 1]} : vector<8x128xf32> to vector<8x64xf32>
    %69 = vector.extract_strided_slice %67 {offsets = [0, 64], sizes = [8, 64], strides = [1, 1]} : vector<8x128xf32> to vector<8x64xf32>
    %70 = vector.extract_strided_slice %58 {offsets = [0, 128], sizes = [8, 64], strides = [1, 1]} : vector<8x192xf32> to vector<8x64xf32>
    %71 = vector.extract_strided_slice %59 {offsets = [0, 128], sizes = [8, 64], strides = [1, 1]} : vector<8x192xf32> to vector<8x64xf32>
    %72 = arith.addf %71, %10 : vector<8x64xf32>
    %73 = arith.mulf %68, %72 : vector<8x64xf32>
    %74 = arith.addf %70, %73 : vector<8x64xf32>
    %75 = math.tanh %74 : vector<8x64xf32>
    %76 = arith.subf %55, %75 : vector<8x64xf32>
    %77 = arith.mulf %69, %76 : vector<8x64xf32>
    %78 = arith.addf %75, %77 : vector<8x64xf32>
    %c16_28 = arith.constant 16 : index
    %c0_29 = arith.constant 0 : index
    %79 = vector.load %arg15[%c16_28, %c0_29] : memref<64x64xf32, #tpu.memory_space<vmem>>, vector<8x64xf32>
    tpu.vector_store %arg15[%c16_28, %c0_29], %78 {strides = array<i32>} : memref<64x64xf32, #tpu.memory_space<vmem>>, vector<8x64xf32>,
    %c40 = arith.constant 40 : index
    %c0_30 = arith.constant 0 : index
    %80 = vector.load %arg16[%c40, %c0_30] : memref<64x64xf32, #tpu.memory_space<vmem>>, vector<8x64xf32>
    tpu.vector_store %arg16[%c40, %c0_30], %78 {strides = array<i32>} : memref<64x64xf32, #tpu.memory_space<vmem>>, vector<8x64xf32>,
    %c24 = arith.constant 24 : index
    %c0_31 = arith.constant 0 : index
    %81 = vector.load %arg14[%c24, %c0_31] : memref<64x192xf32, #tpu.memory_space<vmem>>, vector<8x192xf32>
    %cst_32 = arith.constant dense<0.000000e+00> : vector<8x192xf32>
    %82 = tpu.matmul %78, %7, %cst_32 {dimension_numbers = #tpu.dot_dimension_numbers<[1], [0], [0], [1], [0, 0, 1, 1], [], []>} : vector<8x64xf32>, vector<64x192xf32>, vector<8x192xf32> -> vector<8x192xf32>
    %83 = vector.extract_strided_slice %81 {offsets = [0, 0], sizes = [8, 128], strides = [1, 1]} : vector<8x192xf32> to vector<8x128xf32>
    %84 = vector.extract_strided_slice %82 {offsets = [0, 0], sizes = [8, 128], strides = [1, 1]} : vector<8x192xf32> to vector<8x128xf32>
    %85 = arith.addf %83, %84 : vector<8x128xf32>
    %86 = arith.negf %85 : vector<8x128xf32>
    %87 = math.exp %86 : vector<8x128xf32>
    %cst_33 = arith.constant 1.000000e+00 : f32
    %88 = vector.broadcast %cst_33 : f32 to vector<8x128xf32>
    %89 = arith.addf %88, %87 : vector<8x128xf32>
    %90 = arith.divf %88, %89 : vector<8x128xf32>
    %91 = vector.extract_strided_slice %90 {offsets = [0, 0], sizes = [8, 64], strides = [1, 1]} : vector<8x128xf32> to vector<8x64xf32>
    %92 = vector.extract_strided_slice %90 {offsets = [0, 64], sizes = [8, 64], strides = [1, 1]} : vector<8x128xf32> to vector<8x64xf32>
    %93 = vector.extract_strided_slice %81 {offsets = [0, 128], sizes = [8, 64], strides = [1, 1]} : vector<8x192xf32> to vector<8x64xf32>
    %94 = vector.extract_strided_slice %82 {offsets = [0, 128], sizes = [8, 64], strides = [1, 1]} : vector<8x192xf32> to vector<8x64xf32>
    %95 = arith.addf %94, %10 : vector<8x64xf32>
    %96 = arith.mulf %91, %95 : vector<8x64xf32>
    %97 = arith.addf %93, %96 : vector<8x64xf32>
    %98 = math.tanh %97 : vector<8x64xf32>
    %99 = arith.subf %78, %98 : vector<8x64xf32>
    %100 = arith.mulf %92, %99 : vector<8x64xf32>
    %101 = arith.addf %98, %100 : vector<8x64xf32>
    %c24_34 = arith.constant 24 : index
    %c0_35 = arith.constant 0 : index
    %102 = vector.load %arg15[%c24_34, %c0_35] : memref<64x64xf32, #tpu.memory_space<vmem>>, vector<8x64xf32>
    tpu.vector_store %arg15[%c24_34, %c0_35], %101 {strides = array<i32>} : memref<64x64xf32, #tpu.memory_space<vmem>>, vector<8x64xf32>,
    %c32 = arith.constant 32 : index
    %c0_36 = arith.constant 0 : index
    %103 = vector.load %arg16[%c32, %c0_36] : memref<64x64xf32, #tpu.memory_space<vmem>>, vector<8x64xf32>
    tpu.vector_store %arg16[%c32, %c0_36], %101 {strides = array<i32>} : memref<64x64xf32, #tpu.memory_space<vmem>>, vector<8x64xf32>,
    %c32_37 = arith.constant 32 : index
    %c0_38 = arith.constant 0 : index
    %104 = vector.load %arg14[%c32_37, %c0_38] : memref<64x192xf32, #tpu.memory_space<vmem>>, vector<8x192xf32>
    %cst_39 = arith.constant dense<0.000000e+00> : vector<8x192xf32>
    %105 = tpu.matmul %101, %7, %cst_39 {dimension_numbers = #tpu.dot_dimension_numbers<[1], [0], [0], [1], [0, 0, 1, 1], [], []>} : vector<8x64xf32>, vector<64x192xf32>, vector<8x192xf32> -> vector<8x192xf32>
    %106 = vector.extract_strided_slice %104 {offsets = [0, 0], sizes = [8, 128], strides = [1, 1]} : vector<8x192xf32> to vector<8x128xf32>
    %107 = vector.extract_strided_slice %105 {offsets = [0, 0], sizes = [8, 128], strides = [1, 1]} : vector<8x192xf32> to vector<8x128xf32>
    %108 = arith.addf %106, %107 : vector<8x128xf32>
    %109 = arith.negf %108 : vector<8x128xf32>
    %110 = math.exp %109 : vector<8x128xf32>
    %cst_40 = arith.constant 1.000000e+00 : f32
    %111 = vector.broadcast %cst_40 : f32 to vector<8x128xf32>
    %112 = arith.addf %111, %110 : vector<8x128xf32>
    %113 = arith.divf %111, %112 : vector<8x128xf32>
    %114 = vector.extract_strided_slice %113 {offsets = [0, 0], sizes = [8, 64], strides = [1, 1]} : vector<8x128xf32> to vector<8x64xf32>
    %115 = vector.extract_strided_slice %113 {offsets = [0, 64], sizes = [8, 64], strides = [1, 1]} : vector<8x128xf32> to vector<8x64xf32>
    %116 = vector.extract_strided_slice %104 {offsets = [0, 128], sizes = [8, 64], strides = [1, 1]} : vector<8x192xf32> to vector<8x64xf32>
    %117 = vector.extract_strided_slice %105 {offsets = [0, 128], sizes = [8, 64], strides = [1, 1]} : vector<8x192xf32> to vector<8x64xf32>
    %118 = arith.addf %117, %10 : vector<8x64xf32>
    %119 = arith.mulf %114, %118 : vector<8x64xf32>
    %120 = arith.addf %116, %119 : vector<8x64xf32>
    %121 = math.tanh %120 : vector<8x64xf32>
    %122 = arith.subf %101, %121 : vector<8x64xf32>
    %123 = arith.mulf %115, %122 : vector<8x64xf32>
    %124 = arith.addf %121, %123 : vector<8x64xf32>
    %c32_41 = arith.constant 32 : index
    %c0_42 = arith.constant 0 : index
    %125 = vector.load %arg15[%c32_41, %c0_42] : memref<64x64xf32, #tpu.memory_space<vmem>>, vector<8x64xf32>
    tpu.vector_store %arg15[%c32_41, %c0_42], %124 {strides = array<i32>} : memref<64x64xf32, #tpu.memory_space<vmem>>, vector<8x64xf32>,
    %c24_43 = arith.constant 24 : index
    %c0_44 = arith.constant 0 : index
    %126 = vector.load %arg16[%c24_43, %c0_44] : memref<64x64xf32, #tpu.memory_space<vmem>>, vector<8x64xf32>
    tpu.vector_store %arg16[%c24_43, %c0_44], %124 {strides = array<i32>} : memref<64x64xf32, #tpu.memory_space<vmem>>, vector<8x64xf32>,
    %c40_45 = arith.constant 40 : index
    %c0_46 = arith.constant 0 : index
    %127 = vector.load %arg14[%c40_45, %c0_46] : memref<64x192xf32, #tpu.memory_space<vmem>>, vector<8x192xf32>
    %cst_47 = arith.constant dense<0.000000e+00> : vector<8x192xf32>
    %128 = tpu.matmul %124, %7, %cst_47 {dimension_numbers = #tpu.dot_dimension_numbers<[1], [0], [0], [1], [0, 0, 1, 1], [], []>} : vector<8x64xf32>, vector<64x192xf32>, vector<8x192xf32> -> vector<8x192xf32>
    %129 = vector.extract_strided_slice %127 {offsets = [0, 0], sizes = [8, 128], strides = [1, 1]} : vector<8x192xf32> to vector<8x128xf32>
    %130 = vector.extract_strided_slice %128 {offsets = [0, 0], sizes = [8, 128], strides = [1, 1]} : vector<8x192xf32> to vector<8x128xf32>
    %131 = arith.addf %129, %130 : vector<8x128xf32>
    %132 = arith.negf %131 : vector<8x128xf32>
    %133 = math.exp %132 : vector<8x128xf32>
    %cst_48 = arith.constant 1.000000e+00 : f32
    %134 = vector.broadcast %cst_48 : f32 to vector<8x128xf32>
    %135 = arith.addf %134, %133 : vector<8x128xf32>
    %136 = arith.divf %134, %135 : vector<8x128xf32>
    %137 = vector.extract_strided_slice %136 {offsets = [0, 0], sizes = [8, 64], strides = [1, 1]} : vector<8x128xf32> to vector<8x64xf32>
    %138 = vector.extract_strided_slice %136 {offsets = [0, 64], sizes = [8, 64], strides = [1, 1]} : vector<8x128xf32> to vector<8x64xf32>
    %139 = vector.extract_strided_slice %127 {offsets = [0, 128], sizes = [8, 64], strides = [1, 1]} : vector<8x192xf32> to vector<8x64xf32>
    %140 = vector.extract_strided_slice %128 {offsets = [0, 128], sizes = [8, 64], strides = [1, 1]} : vector<8x192xf32> to vector<8x64xf32>
    %141 = arith.addf %140, %10 : vector<8x64xf32>
    %142 = arith.mulf %137, %141 : vector<8x64xf32>
    %143 = arith.addf %139, %142 : vector<8x64xf32>
    %144 = math.tanh %143 : vector<8x64xf32>
    %145 = arith.subf %124, %144 : vector<8x64xf32>
    %146 = arith.mulf %138, %145 : vector<8x64xf32>
    %147 = arith.addf %144, %146 : vector<8x64xf32>
    %c40_49 = arith.constant 40 : index
    %c0_50 = arith.constant 0 : index
    %148 = vector.load %arg15[%c40_49, %c0_50] : memref<64x64xf32, #tpu.memory_space<vmem>>, vector<8x64xf32>
    tpu.vector_store %arg15[%c40_49, %c0_50], %147 {strides = array<i32>} : memref<64x64xf32, #tpu.memory_space<vmem>>, vector<8x64xf32>,
    %c16_51 = arith.constant 16 : index
    %c0_52 = arith.constant 0 : index
    %149 = vector.load %arg16[%c16_51, %c0_52] : memref<64x64xf32, #tpu.memory_space<vmem>>, vector<8x64xf32>
    tpu.vector_store %arg16[%c16_51, %c0_52], %147 {strides = array<i32>} : memref<64x64xf32, #tpu.memory_space<vmem>>, vector<8x64xf32>,
    %c48_53 = arith.constant 48 : index
    %c0_54 = arith.constant 0 : index
    %150 = vector.load %arg14[%c48_53, %c0_54] : memref<64x192xf32, #tpu.memory_space<vmem>>, vector<8x192xf32>
    %cst_55 = arith.constant dense<0.000000e+00> : vector<8x192xf32>
    %151 = tpu.matmul %147, %7, %cst_55 {dimension_numbers = #tpu.dot_dimension_numbers<[1], [0], [0], [1], [0, 0, 1, 1], [], []>} : vector<8x64xf32>, vector<64x192xf32>, vector<8x192xf32> -> vector<8x192xf32>
    %152 = vector.extract_strided_slice %150 {offsets = [0, 0], sizes = [8, 128], strides = [1, 1]} : vector<8x192xf32> to vector<8x128xf32>
    %153 = vector.extract_strided_slice %151 {offsets = [0, 0], sizes = [8, 128], strides = [1, 1]} : vector<8x192xf32> to vector<8x128xf32>
    %154 = arith.addf %152, %153 : vector<8x128xf32>
    %155 = arith.negf %154 : vector<8x128xf32>
    %156 = math.exp %155 : vector<8x128xf32>
    %cst_56 = arith.constant 1.000000e+00 : f32
    %157 = vector.broadcast %cst_56 : f32 to vector<8x128xf32>
    %158 = arith.addf %157, %156 : vector<8x128xf32>
    %159 = arith.divf %157, %158 : vector<8x128xf32>
    %160 = vector.extract_strided_slice %159 {offsets = [0, 0], sizes = [8, 64], strides = [1, 1]} : vector<8x128xf32> to vector<8x64xf32>
    %161 = vector.extract_strided_slice %159 {offsets = [0, 64], sizes = [8, 64], strides = [1, 1]} : vector<8x128xf32> to vector<8x64xf32>
    %162 = vector.extract_strided_slice %150 {offsets = [0, 128], sizes = [8, 64], strides = [1, 1]} : vector<8x192xf32> to vector<8x64xf32>
    %163 = vector.extract_strided_slice %151 {offsets = [0, 128], sizes = [8, 64], strides = [1, 1]} : vector<8x192xf32> to vector<8x64xf32>
    %164 = arith.addf %163, %10 : vector<8x64xf32>
    %165 = arith.mulf %160, %164 : vector<8x64xf32>
    %166 = arith.addf %162, %165 : vector<8x64xf32>
    %167 = math.tanh %166 : vector<8x64xf32>
    %168 = arith.subf %147, %167 : vector<8x64xf32>
    %169 = arith.mulf %161, %168 : vector<8x64xf32>
    %170 = arith.addf %167, %169 : vector<8x64xf32>
    %c48_57 = arith.constant 48 : index
    %c0_58 = arith.constant 0 : index
    %171 = vector.load %arg15[%c48_57, %c0_58] : memref<64x64xf32, #tpu.memory_space<vmem>>, vector<8x64xf32>
    tpu.vector_store %arg15[%c48_57, %c0_58], %170 {strides = array<i32>} : memref<64x64xf32, #tpu.memory_space<vmem>>, vector<8x64xf32>,
    %c8_59 = arith.constant 8 : index
    %c0_60 = arith.constant 0 : index
    %172 = vector.load %arg16[%c8_59, %c0_60] : memref<64x64xf32, #tpu.memory_space<vmem>>, vector<8x64xf32>
    tpu.vector_store %arg16[%c8_59, %c0_60], %170 {strides = array<i32>} : memref<64x64xf32, #tpu.memory_space<vmem>>, vector<8x64xf32>,
    %c56_61 = arith.constant 56 : index
    %c0_62 = arith.constant 0 : index
    %173 = vector.load %arg14[%c56_61, %c0_62] : memref<64x192xf32, #tpu.memory_space<vmem>>, vector<8x192xf32>
    %cst_63 = arith.constant dense<0.000000e+00> : vector<8x192xf32>
    %174 = tpu.matmul %170, %7, %cst_63 {dimension_numbers = #tpu.dot_dimension_numbers<[1], [0], [0], [1], [0, 0, 1, 1], [], []>} : vector<8x64xf32>, vector<64x192xf32>, vector<8x192xf32> -> vector<8x192xf32>
    %175 = vector.extract_strided_slice %173 {offsets = [0, 0], sizes = [8, 128], strides = [1, 1]} : vector<8x192xf32> to vector<8x128xf32>
    %176 = vector.extract_strided_slice %174 {offsets = [0, 0], sizes = [8, 128], strides = [1, 1]} : vector<8x192xf32> to vector<8x128xf32>
    %177 = arith.addf %175, %176 : vector<8x128xf32>
    %178 = arith.negf %177 : vector<8x128xf32>
    %179 = math.exp %178 : vector<8x128xf32>
    %cst_64 = arith.constant 1.000000e+00 : f32
    %180 = vector.broadcast %cst_64 : f32 to vector<8x128xf32>
    %181 = arith.addf %180, %179 : vector<8x128xf32>
    %182 = arith.divf %180, %181 : vector<8x128xf32>
    %183 = vector.extract_strided_slice %182 {offsets = [0, 0], sizes = [8, 64], strides = [1, 1]} : vector<8x128xf32> to vector<8x64xf32>
    %184 = vector.extract_strided_slice %182 {offsets = [0, 64], sizes = [8, 64], strides = [1, 1]} : vector<8x128xf32> to vector<8x64xf32>
    %185 = vector.extract_strided_slice %173 {offsets = [0, 128], sizes = [8, 64], strides = [1, 1]} : vector<8x192xf32> to vector<8x64xf32>
    %186 = vector.extract_strided_slice %174 {offsets = [0, 128], sizes = [8, 64], strides = [1, 1]} : vector<8x192xf32> to vector<8x64xf32>
    %187 = arith.addf %186, %10 : vector<8x64xf32>
    %188 = arith.mulf %183, %187 : vector<8x64xf32>
    %189 = arith.addf %185, %188 : vector<8x64xf32>
    %190 = math.tanh %189 : vector<8x64xf32>
    %191 = arith.subf %170, %190 : vector<8x64xf32>
    %192 = arith.mulf %184, %191 : vector<8x64xf32>
    %193 = arith.addf %190, %192 : vector<8x64xf32>
    %c56_65 = arith.constant 56 : index
    %c0_66 = arith.constant 0 : index
    %194 = vector.load %arg15[%c56_65, %c0_66] : memref<64x64xf32, #tpu.memory_space<vmem>>, vector<8x64xf32>
    tpu.vector_store %arg15[%c56_65, %c0_66], %193 {strides = array<i32>} : memref<64x64xf32, #tpu.memory_space<vmem>>, vector<8x64xf32>,
    %c0_67 = arith.constant 0 : index
    %c0_68 = arith.constant 0 : index
    %195 = vector.load %arg16[%c0_67, %c0_68] : memref<64x64xf32, #tpu.memory_space<vmem>>, vector<8x64xf32>
    tpu.vector_store %arg16[%c0_67, %c0_68], %193 {strides = array<i32>} : memref<64x64xf32, #tpu.memory_space<vmem>>, vector<8x64xf32>,
    %c0_69 = arith.constant 0 : index
    %c0_70 = arith.constant 0 : index
    %196 = vector.load %arg15[%c0_69, %c0_70] : memref<64x64xf32, #tpu.memory_space<vmem>>, vector<64x64xf32>
    %c0_71 = arith.constant 0 : index
    %c0_72 = arith.constant 0 : index
    %197 = vector.load %arg5[%c0_71, %c0_72] : memref<64x192xf32, #tpu.memory_space<vmem>>, vector<64x192xf32>
    %cst_73 = arith.constant dense<0.000000e+00> : vector<64x192xf32>
    %198 = tpu.matmul %196, %197, %cst_73 {dimension_numbers = #tpu.dot_dimension_numbers<[1], [0], [0], [1], [0, 0, 1, 1], [], []>} : vector<64x64xf32>, vector<64x192xf32>, vector<64x192xf32> -> vector<64x192xf32>
    %c0_74 = arith.constant 0 : index
    %c0_75 = arith.constant 0 : index
    %199 = vector.load %arg16[%c0_74, %c0_75] : memref<64x64xf32, #tpu.memory_space<vmem>>, vector<64x64xf32>
    %c0_76 = arith.constant 0 : index
    %c0_77 = arith.constant 0 : index
    %200 = vector.load %arg6[%c0_76, %c0_77] : memref<64x192xf32, #tpu.memory_space<vmem>>, vector<64x192xf32>
    %cst_78 = arith.constant dense<0.000000e+00> : vector<64x192xf32>
    %201 = tpu.matmul %199, %200, %cst_78 {dimension_numbers = #tpu.dot_dimension_numbers<[1], [0], [0], [1], [0, 0, 1, 1], [], []>} : vector<64x64xf32>, vector<64x192xf32>, vector<64x192xf32> -> vector<64x192xf32>
    %202 = arith.addf %198, %201 : vector<64x192xf32>
    %c0_79 = arith.constant 0 : index
    %c0_80 = arith.constant 0 : index
    %203 = vector.load %arg7[%c0_79, %c0_80] : memref<1x192xf32, #tpu.memory_space<vmem>>, vector<1x192xf32>
    %204 = vector.broadcast %203 : vector<1x192xf32> to vector<64x192xf32>
    %205 = arith.addf %202, %204 : vector<64x192xf32>
    %c0_81 = arith.constant 0 : index
    %c0_82 = arith.constant 0 : index
    %206 = vector.load %arg14[%c0_81, %c0_82] : memref<64x192xf32, #tpu.memory_space<vmem>>, vector<64x192xf32>
    tpu.vector_store %arg14[%c0_81, %c0_82], %205 {strides = array<i32>} : memref<64x192xf32, #tpu.memory_space<vmem>>, vector<64x192xf32>,
    %c0_83 = arith.constant 0 : index
    %c0_84 = arith.constant 0 : index
    %207 = vector.load %arg8[%c0_83, %c0_84] : memref<64x192xf32, #tpu.memory_space<vmem>>, vector<64x192xf32>
    %c0_85 = arith.constant 0 : index
    %c0_86 = arith.constant 0 : index
    %208 = vector.load %arg9[%c0_85, %c0_86] : memref<1x64xf32, #tpu.memory_space<vmem>>, vector<1x64xf32>
    %209 = vector.shape_cast %208 : vector<1x64xf32> to vector<1x64xf32>
    %210 = vector.broadcast %209 : vector<1x64xf32> to vector<8x64xf32>
    %cst_87 = arith.constant 0.000000e+00 : f32
    %211 = vector.broadcast %cst_87 : f32 to vector<8x64xf32>
    %c0_88 = arith.constant 0 : index
    %c0_89 = arith.constant 0 : index
    %212 = vector.load %arg14[%c0_88, %c0_89] : memref<64x192xf32, #tpu.memory_space<vmem>>, vector<8x192xf32>
    %cst_90 = arith.constant dense<0.000000e+00> : vector<8x192xf32>
    %213 = tpu.matmul %211, %207, %cst_90 {dimension_numbers = #tpu.dot_dimension_numbers<[1], [0], [0], [1], [0, 0, 1, 1], [], []>} : vector<8x64xf32>, vector<64x192xf32>, vector<8x192xf32> -> vector<8x192xf32>
    %214 = vector.extract_strided_slice %212 {offsets = [0, 0], sizes = [8, 128], strides = [1, 1]} : vector<8x192xf32> to vector<8x128xf32>
    %215 = vector.extract_strided_slice %213 {offsets = [0, 0], sizes = [8, 128], strides = [1, 1]} : vector<8x192xf32> to vector<8x128xf32>
    %216 = arith.addf %214, %215 : vector<8x128xf32>
    %217 = arith.negf %216 : vector<8x128xf32>
    %218 = math.exp %217 : vector<8x128xf32>
    %cst_91 = arith.constant 1.000000e+00 : f32
    %219 = vector.broadcast %cst_91 : f32 to vector<8x128xf32>
    %220 = arith.addf %219, %218 : vector<8x128xf32>
    %221 = arith.divf %219, %220 : vector<8x128xf32>
    %222 = vector.extract_strided_slice %221 {offsets = [0, 0], sizes = [8, 64], strides = [1, 1]} : vector<8x128xf32> to vector<8x64xf32>
    %223 = vector.extract_strided_slice %221 {offsets = [0, 64], sizes = [8, 64], strides = [1, 1]} : vector<8x128xf32> to vector<8x64xf32>
    %224 = vector.extract_strided_slice %212 {offsets = [0, 128], sizes = [8, 64], strides = [1, 1]} : vector<8x192xf32> to vector<8x64xf32>
    %225 = vector.extract_strided_slice %213 {offsets = [0, 128], sizes = [8, 64], strides = [1, 1]} : vector<8x192xf32> to vector<8x64xf32>
    %226 = arith.addf %225, %210 : vector<8x64xf32>
    %227 = arith.mulf %222, %226 : vector<8x64xf32>
    %228 = arith.addf %224, %227 : vector<8x64xf32>
    %229 = math.tanh %228 : vector<8x64xf32>
    %230 = arith.subf %211, %229 : vector<8x64xf32>
    %231 = arith.mulf %223, %230 : vector<8x64xf32>
    %232 = arith.addf %229, %231 : vector<8x64xf32>
    %c0_92 = arith.constant 0 : index
    %c0_93 = arith.constant 0 : index
    %233 = vector.load %arg15[%c0_92, %c0_93] : memref<64x64xf32, #tpu.memory_space<vmem>>, vector<8x64xf32>
    tpu.vector_store %arg15[%c0_92, %c0_93], %232 {strides = array<i32>} : memref<64x64xf32, #tpu.memory_space<vmem>>, vector<8x64xf32>,
    %c56_94 = arith.constant 56 : index
    %c0_95 = arith.constant 0 : index
    %234 = vector.load %arg16[%c56_94, %c0_95] : memref<64x64xf32, #tpu.memory_space<vmem>>, vector<8x64xf32>
    tpu.vector_store %arg16[%c56_94, %c0_95], %232 {strides = array<i32>} : memref<64x64xf32, #tpu.memory_space<vmem>>, vector<8x64xf32>,
    %c8_96 = arith.constant 8 : index
    %c0_97 = arith.constant 0 : index
    %235 = vector.load %arg14[%c8_96, %c0_97] : memref<64x192xf32, #tpu.memory_space<vmem>>, vector<8x192xf32>
    %cst_98 = arith.constant dense<0.000000e+00> : vector<8x192xf32>
    %236 = tpu.matmul %232, %207, %cst_98 {dimension_numbers = #tpu.dot_dimension_numbers<[1], [0], [0], [1], [0, 0, 1, 1], [], []>} : vector<8x64xf32>, vector<64x192xf32>, vector<8x192xf32> -> vector<8x192xf32>
    %237 = vector.extract_strided_slice %235 {offsets = [0, 0], sizes = [8, 128], strides = [1, 1]} : vector<8x192xf32> to vector<8x128xf32>
    %238 = vector.extract_strided_slice %236 {offsets = [0, 0], sizes = [8, 128], strides = [1, 1]} : vector<8x192xf32> to vector<8x128xf32>
    %239 = arith.addf %237, %238 : vector<8x128xf32>
    %240 = arith.negf %239 : vector<8x128xf32>
    %241 = math.exp %240 : vector<8x128xf32>
    %cst_99 = arith.constant 1.000000e+00 : f32
    %242 = vector.broadcast %cst_99 : f32 to vector<8x128xf32>
    %243 = arith.addf %242, %241 : vector<8x128xf32>
    %244 = arith.divf %242, %243 : vector<8x128xf32>
    %245 = vector.extract_strided_slice %244 {offsets = [0, 0], sizes = [8, 64], strides = [1, 1]} : vector<8x128xf32> to vector<8x64xf32>
    %246 = vector.extract_strided_slice %244 {offsets = [0, 64], sizes = [8, 64], strides = [1, 1]} : vector<8x128xf32> to vector<8x64xf32>
    %247 = vector.extract_strided_slice %235 {offsets = [0, 128], sizes = [8, 64], strides = [1, 1]} : vector<8x192xf32> to vector<8x64xf32>
    %248 = vector.extract_strided_slice %236 {offsets = [0, 128], sizes = [8, 64], strides = [1, 1]} : vector<8x192xf32> to vector<8x64xf32>
    %249 = arith.addf %248, %210 : vector<8x64xf32>
    %250 = arith.mulf %245, %249 : vector<8x64xf32>
    %251 = arith.addf %247, %250 : vector<8x64xf32>
    %252 = math.tanh %251 : vector<8x64xf32>
    %253 = arith.subf %232, %252 : vector<8x64xf32>
    %254 = arith.mulf %246, %253 : vector<8x64xf32>
    %255 = arith.addf %252, %254 : vector<8x64xf32>
    %c8_100 = arith.constant 8 : index
    %c0_101 = arith.constant 0 : index
    %256 = vector.load %arg15[%c8_100, %c0_101] : memref<64x64xf32, #tpu.memory_space<vmem>>, vector<8x64xf32>
    tpu.vector_store %arg15[%c8_100, %c0_101], %255 {strides = array<i32>} : memref<64x64xf32, #tpu.memory_space<vmem>>, vector<8x64xf32>,
    %c48_102 = arith.constant 48 : index
    %c0_103 = arith.constant 0 : index
    %257 = vector.load %arg16[%c48_102, %c0_103] : memref<64x64xf32, #tpu.memory_space<vmem>>, vector<8x64xf32>
    tpu.vector_store %arg16[%c48_102, %c0_103], %255 {strides = array<i32>} : memref<64x64xf32, #tpu.memory_space<vmem>>, vector<8x64xf32>,
    %c16_104 = arith.constant 16 : index
    %c0_105 = arith.constant 0 : index
    %258 = vector.load %arg14[%c16_104, %c0_105] : memref<64x192xf32, #tpu.memory_space<vmem>>, vector<8x192xf32>
    %cst_106 = arith.constant dense<0.000000e+00> : vector<8x192xf32>
    %259 = tpu.matmul %255, %207, %cst_106 {dimension_numbers = #tpu.dot_dimension_numbers<[1], [0], [0], [1], [0, 0, 1, 1], [], []>} : vector<8x64xf32>, vector<64x192xf32>, vector<8x192xf32> -> vector<8x192xf32>
    %260 = vector.extract_strided_slice %258 {offsets = [0, 0], sizes = [8, 128], strides = [1, 1]} : vector<8x192xf32> to vector<8x128xf32>
    %261 = vector.extract_strided_slice %259 {offsets = [0, 0], sizes = [8, 128], strides = [1, 1]} : vector<8x192xf32> to vector<8x128xf32>
    %262 = arith.addf %260, %261 : vector<8x128xf32>
    %263 = arith.negf %262 : vector<8x128xf32>
    %264 = math.exp %263 : vector<8x128xf32>
    %cst_107 = arith.constant 1.000000e+00 : f32
    %265 = vector.broadcast %cst_107 : f32 to vector<8x128xf32>
    %266 = arith.addf %265, %264 : vector<8x128xf32>
    %267 = arith.divf %265, %266 : vector<8x128xf32>
    %268 = vector.extract_strided_slice %267 {offsets = [0, 0], sizes = [8, 64], strides = [1, 1]} : vector<8x128xf32> to vector<8x64xf32>
    %269 = vector.extract_strided_slice %267 {offsets = [0, 64], sizes = [8, 64], strides = [1, 1]} : vector<8x128xf32> to vector<8x64xf32>
    %270 = vector.extract_strided_slice %258 {offsets = [0, 128], sizes = [8, 64], strides = [1, 1]} : vector<8x192xf32> to vector<8x64xf32>
    %271 = vector.extract_strided_slice %259 {offsets = [0, 128], sizes = [8, 64], strides = [1, 1]} : vector<8x192xf32> to vector<8x64xf32>
    %272 = arith.addf %271, %210 : vector<8x64xf32>
    %273 = arith.mulf %268, %272 : vector<8x64xf32>
    %274 = arith.addf %270, %273 : vector<8x64xf32>
    %275 = math.tanh %274 : vector<8x64xf32>
    %276 = arith.subf %255, %275 : vector<8x64xf32>
    %277 = arith.mulf %269, %276 : vector<8x64xf32>
    %278 = arith.addf %275, %277 : vector<8x64xf32>
    %c16_108 = arith.constant 16 : index
    %c0_109 = arith.constant 0 : index
    %279 = vector.load %arg15[%c16_108, %c0_109] : memref<64x64xf32, #tpu.memory_space<vmem>>, vector<8x64xf32>
    tpu.vector_store %arg15[%c16_108, %c0_109], %278 {strides = array<i32>} : memref<64x64xf32, #tpu.memory_space<vmem>>, vector<8x64xf32>,
    %c40_110 = arith.constant 40 : index
    %c0_111 = arith.constant 0 : index
    %280 = vector.load %arg16[%c40_110, %c0_111] : memref<64x64xf32, #tpu.memory_space<vmem>>, vector<8x64xf32>
    tpu.vector_store %arg16[%c40_110, %c0_111], %278 {strides = array<i32>} : memref<64x64xf32, #tpu.memory_space<vmem>>, vector<8x64xf32>,
    %c24_112 = arith.constant 24 : index
    %c0_113 = arith.constant 0 : index
    %281 = vector.load %arg14[%c24_112, %c0_113] : memref<64x192xf32, #tpu.memory_space<vmem>>, vector<8x192xf32>
    %cst_114 = arith.constant dense<0.000000e+00> : vector<8x192xf32>
    %282 = tpu.matmul %278, %207, %cst_114 {dimension_numbers = #tpu.dot_dimension_numbers<[1], [0], [0], [1], [0, 0, 1, 1], [], []>} : vector<8x64xf32>, vector<64x192xf32>, vector<8x192xf32> -> vector<8x192xf32>
    %283 = vector.extract_strided_slice %281 {offsets = [0, 0], sizes = [8, 128], strides = [1, 1]} : vector<8x192xf32> to vector<8x128xf32>
    %284 = vector.extract_strided_slice %282 {offsets = [0, 0], sizes = [8, 128], strides = [1, 1]} : vector<8x192xf32> to vector<8x128xf32>
    %285 = arith.addf %283, %284 : vector<8x128xf32>
    %286 = arith.negf %285 : vector<8x128xf32>
    %287 = math.exp %286 : vector<8x128xf32>
    %cst_115 = arith.constant 1.000000e+00 : f32
    %288 = vector.broadcast %cst_115 : f32 to vector<8x128xf32>
    %289 = arith.addf %288, %287 : vector<8x128xf32>
    %290 = arith.divf %288, %289 : vector<8x128xf32>
    %291 = vector.extract_strided_slice %290 {offsets = [0, 0], sizes = [8, 64], strides = [1, 1]} : vector<8x128xf32> to vector<8x64xf32>
    %292 = vector.extract_strided_slice %290 {offsets = [0, 64], sizes = [8, 64], strides = [1, 1]} : vector<8x128xf32> to vector<8x64xf32>
    %293 = vector.extract_strided_slice %281 {offsets = [0, 128], sizes = [8, 64], strides = [1, 1]} : vector<8x192xf32> to vector<8x64xf32>
    %294 = vector.extract_strided_slice %282 {offsets = [0, 128], sizes = [8, 64], strides = [1, 1]} : vector<8x192xf32> to vector<8x64xf32>
    %295 = arith.addf %294, %210 : vector<8x64xf32>
    %296 = arith.mulf %291, %295 : vector<8x64xf32>
    %297 = arith.addf %293, %296 : vector<8x64xf32>
    %298 = math.tanh %297 : vector<8x64xf32>
    %299 = arith.subf %278, %298 : vector<8x64xf32>
    %300 = arith.mulf %292, %299 : vector<8x64xf32>
    %301 = arith.addf %298, %300 : vector<8x64xf32>
    %c24_116 = arith.constant 24 : index
    %c0_117 = arith.constant 0 : index
    %302 = vector.load %arg15[%c24_116, %c0_117] : memref<64x64xf32, #tpu.memory_space<vmem>>, vector<8x64xf32>
    tpu.vector_store %arg15[%c24_116, %c0_117], %301 {strides = array<i32>} : memref<64x64xf32, #tpu.memory_space<vmem>>, vector<8x64xf32>,
    %c32_118 = arith.constant 32 : index
    %c0_119 = arith.constant 0 : index
    %303 = vector.load %arg16[%c32_118, %c0_119] : memref<64x64xf32, #tpu.memory_space<vmem>>, vector<8x64xf32>
    tpu.vector_store %arg16[%c32_118, %c0_119], %301 {strides = array<i32>} : memref<64x64xf32, #tpu.memory_space<vmem>>, vector<8x64xf32>,
    %c32_120 = arith.constant 32 : index
    %c0_121 = arith.constant 0 : index
    %304 = vector.load %arg14[%c32_120, %c0_121] : memref<64x192xf32, #tpu.memory_space<vmem>>, vector<8x192xf32>
    %cst_122 = arith.constant dense<0.000000e+00> : vector<8x192xf32>
    %305 = tpu.matmul %301, %207, %cst_122 {dimension_numbers = #tpu.dot_dimension_numbers<[1], [0], [0], [1], [0, 0, 1, 1], [], []>} : vector<8x64xf32>, vector<64x192xf32>, vector<8x192xf32> -> vector<8x192xf32>
    %306 = vector.extract_strided_slice %304 {offsets = [0, 0], sizes = [8, 128], strides = [1, 1]} : vector<8x192xf32> to vector<8x128xf32>
    %307 = vector.extract_strided_slice %305 {offsets = [0, 0], sizes = [8, 128], strides = [1, 1]} : vector<8x192xf32> to vector<8x128xf32>
    %308 = arith.addf %306, %307 : vector<8x128xf32>
    %309 = arith.negf %308 : vector<8x128xf32>
    %310 = math.exp %309 : vector<8x128xf32>
    %cst_123 = arith.constant 1.000000e+00 : f32
    %311 = vector.broadcast %cst_123 : f32 to vector<8x128xf32>
    %312 = arith.addf %311, %310 : vector<8x128xf32>
    %313 = arith.divf %311, %312 : vector<8x128xf32>
    %314 = vector.extract_strided_slice %313 {offsets = [0, 0], sizes = [8, 64], strides = [1, 1]} : vector<8x128xf32> to vector<8x64xf32>
    %315 = vector.extract_strided_slice %313 {offsets = [0, 64], sizes = [8, 64], strides = [1, 1]} : vector<8x128xf32> to vector<8x64xf32>
    %316 = vector.extract_strided_slice %304 {offsets = [0, 128], sizes = [8, 64], strides = [1, 1]} : vector<8x192xf32> to vector<8x64xf32>
    %317 = vector.extract_strided_slice %305 {offsets = [0, 128], sizes = [8, 64], strides = [1, 1]} : vector<8x192xf32> to vector<8x64xf32>
    %318 = arith.addf %317, %210 : vector<8x64xf32>
    %319 = arith.mulf %314, %318 : vector<8x64xf32>
    %320 = arith.addf %316, %319 : vector<8x64xf32>
    %321 = math.tanh %320 : vector<8x64xf32>
    %322 = arith.subf %301, %321 : vector<8x64xf32>
    %323 = arith.mulf %315, %322 : vector<8x64xf32>
    %324 = arith.addf %321, %323 : vector<8x64xf32>
    %c32_124 = arith.constant 32 : index
    %c0_125 = arith.constant 0 : index
    %325 = vector.load %arg15[%c32_124, %c0_125] : memref<64x64xf32, #tpu.memory_space<vmem>>, vector<8x64xf32>
    tpu.vector_store %arg15[%c32_124, %c0_125], %324 {strides = array<i32>} : memref<64x64xf32, #tpu.memory_space<vmem>>, vector<8x64xf32>,
    %c24_126 = arith.constant 24 : index
    %c0_127 = arith.constant 0 : index
    %326 = vector.load %arg16[%c24_126, %c0_127] : memref<64x64xf32, #tpu.memory_space<vmem>>, vector<8x64xf32>
    tpu.vector_store %arg16[%c24_126, %c0_127], %324 {strides = array<i32>} : memref<64x64xf32, #tpu.memory_space<vmem>>, vector<8x64xf32>,
    %c40_128 = arith.constant 40 : index
    %c0_129 = arith.constant 0 : index
    %327 = vector.load %arg14[%c40_128, %c0_129] : memref<64x192xf32, #tpu.memory_space<vmem>>, vector<8x192xf32>
    %cst_130 = arith.constant dense<0.000000e+00> : vector<8x192xf32>
    %328 = tpu.matmul %324, %207, %cst_130 {dimension_numbers = #tpu.dot_dimension_numbers<[1], [0], [0], [1], [0, 0, 1, 1], [], []>} : vector<8x64xf32>, vector<64x192xf32>, vector<8x192xf32> -> vector<8x192xf32>
    %329 = vector.extract_strided_slice %327 {offsets = [0, 0], sizes = [8, 128], strides = [1, 1]} : vector<8x192xf32> to vector<8x128xf32>
    %330 = vector.extract_strided_slice %328 {offsets = [0, 0], sizes = [8, 128], strides = [1, 1]} : vector<8x192xf32> to vector<8x128xf32>
    %331 = arith.addf %329, %330 : vector<8x128xf32>
    %332 = arith.negf %331 : vector<8x128xf32>
    %333 = math.exp %332 : vector<8x128xf32>
    %cst_131 = arith.constant 1.000000e+00 : f32
    %334 = vector.broadcast %cst_131 : f32 to vector<8x128xf32>
    %335 = arith.addf %334, %333 : vector<8x128xf32>
    %336 = arith.divf %334, %335 : vector<8x128xf32>
    %337 = vector.extract_strided_slice %336 {offsets = [0, 0], sizes = [8, 64], strides = [1, 1]} : vector<8x128xf32> to vector<8x64xf32>
    %338 = vector.extract_strided_slice %336 {offsets = [0, 64], sizes = [8, 64], strides = [1, 1]} : vector<8x128xf32> to vector<8x64xf32>
    %339 = vector.extract_strided_slice %327 {offsets = [0, 128], sizes = [8, 64], strides = [1, 1]} : vector<8x192xf32> to vector<8x64xf32>
    %340 = vector.extract_strided_slice %328 {offsets = [0, 128], sizes = [8, 64], strides = [1, 1]} : vector<8x192xf32> to vector<8x64xf32>
    %341 = arith.addf %340, %210 : vector<8x64xf32>
    %342 = arith.mulf %337, %341 : vector<8x64xf32>
    %343 = arith.addf %339, %342 : vector<8x64xf32>
    %344 = math.tanh %343 : vector<8x64xf32>
    %345 = arith.subf %324, %344 : vector<8x64xf32>
    %346 = arith.mulf %338, %345 : vector<8x64xf32>
    %347 = arith.addf %344, %346 : vector<8x64xf32>
    %c40_132 = arith.constant 40 : index
    %c0_133 = arith.constant 0 : index
    %348 = vector.load %arg15[%c40_132, %c0_133] : memref<64x64xf32, #tpu.memory_space<vmem>>, vector<8x64xf32>
    tpu.vector_store %arg15[%c40_132, %c0_133], %347 {strides = array<i32>} : memref<64x64xf32, #tpu.memory_space<vmem>>, vector<8x64xf32>,
    %c16_134 = arith.constant 16 : index
    %c0_135 = arith.constant 0 : index
    %349 = vector.load %arg16[%c16_134, %c0_135] : memref<64x64xf32, #tpu.memory_space<vmem>>, vector<8x64xf32>
    tpu.vector_store %arg16[%c16_134, %c0_135], %347 {strides = array<i32>} : memref<64x64xf32, #tpu.memory_space<vmem>>, vector<8x64xf32>,
    %c48_136 = arith.constant 48 : index
    %c0_137 = arith.constant 0 : index
    %350 = vector.load %arg14[%c48_136, %c0_137] : memref<64x192xf32, #tpu.memory_space<vmem>>, vector<8x192xf32>
    %cst_138 = arith.constant dense<0.000000e+00> : vector<8x192xf32>
    %351 = tpu.matmul %347, %207, %cst_138 {dimension_numbers = #tpu.dot_dimension_numbers<[1], [0], [0], [1], [0, 0, 1, 1], [], []>} : vector<8x64xf32>, vector<64x192xf32>, vector<8x192xf32> -> vector<8x192xf32>
    %352 = vector.extract_strided_slice %350 {offsets = [0, 0], sizes = [8, 128], strides = [1, 1]} : vector<8x192xf32> to vector<8x128xf32>
    %353 = vector.extract_strided_slice %351 {offsets = [0, 0], sizes = [8, 128], strides = [1, 1]} : vector<8x192xf32> to vector<8x128xf32>
    %354 = arith.addf %352, %353 : vector<8x128xf32>
    %355 = arith.negf %354 : vector<8x128xf32>
    %356 = math.exp %355 : vector<8x128xf32>
    %cst_139 = arith.constant 1.000000e+00 : f32
    %357 = vector.broadcast %cst_139 : f32 to vector<8x128xf32>
    %358 = arith.addf %357, %356 : vector<8x128xf32>
    %359 = arith.divf %357, %358 : vector<8x128xf32>
    %360 = vector.extract_strided_slice %359 {offsets = [0, 0], sizes = [8, 64], strides = [1, 1]} : vector<8x128xf32> to vector<8x64xf32>
    %361 = vector.extract_strided_slice %359 {offsets = [0, 64], sizes = [8, 64], strides = [1, 1]} : vector<8x128xf32> to vector<8x64xf32>
    %362 = vector.extract_strided_slice %350 {offsets = [0, 128], sizes = [8, 64], strides = [1, 1]} : vector<8x192xf32> to vector<8x64xf32>
    %363 = vector.extract_strided_slice %351 {offsets = [0, 128], sizes = [8, 64], strides = [1, 1]} : vector<8x192xf32> to vector<8x64xf32>
    %364 = arith.addf %363, %210 : vector<8x64xf32>
    %365 = arith.mulf %360, %364 : vector<8x64xf32>
    %366 = arith.addf %362, %365 : vector<8x64xf32>
    %367 = math.tanh %366 : vector<8x64xf32>
    %368 = arith.subf %347, %367 : vector<8x64xf32>
    %369 = arith.mulf %361, %368 : vector<8x64xf32>
    %370 = arith.addf %367, %369 : vector<8x64xf32>
    %c48_140 = arith.constant 48 : index
    %c0_141 = arith.constant 0 : index
    %371 = vector.load %arg15[%c48_140, %c0_141] : memref<64x64xf32, #tpu.memory_space<vmem>>, vector<8x64xf32>
    tpu.vector_store %arg15[%c48_140, %c0_141], %370 {strides = array<i32>} : memref<64x64xf32, #tpu.memory_space<vmem>>, vector<8x64xf32>,
    %c8_142 = arith.constant 8 : index
    %c0_143 = arith.constant 0 : index
    %372 = vector.load %arg16[%c8_142, %c0_143] : memref<64x64xf32, #tpu.memory_space<vmem>>, vector<8x64xf32>
    tpu.vector_store %arg16[%c8_142, %c0_143], %370 {strides = array<i32>} : memref<64x64xf32, #tpu.memory_space<vmem>>, vector<8x64xf32>,
    %c56_144 = arith.constant 56 : index
    %c0_145 = arith.constant 0 : index
    %373 = vector.load %arg14[%c56_144, %c0_145] : memref<64x192xf32, #tpu.memory_space<vmem>>, vector<8x192xf32>
    %cst_146 = arith.constant dense<0.000000e+00> : vector<8x192xf32>
    %374 = tpu.matmul %370, %207, %cst_146 {dimension_numbers = #tpu.dot_dimension_numbers<[1], [0], [0], [1], [0, 0, 1, 1], [], []>} : vector<8x64xf32>, vector<64x192xf32>, vector<8x192xf32> -> vector<8x192xf32>
    %375 = vector.extract_strided_slice %373 {offsets = [0, 0], sizes = [8, 128], strides = [1, 1]} : vector<8x192xf32> to vector<8x128xf32>
    %376 = vector.extract_strided_slice %374 {offsets = [0, 0], sizes = [8, 128], strides = [1, 1]} : vector<8x192xf32> to vector<8x128xf32>
    %377 = arith.addf %375, %376 : vector<8x128xf32>
    %378 = arith.negf %377 : vector<8x128xf32>
    %379 = math.exp %378 : vector<8x128xf32>
    %cst_147 = arith.constant 1.000000e+00 : f32
    %380 = vector.broadcast %cst_147 : f32 to vector<8x128xf32>
    %381 = arith.addf %380, %379 : vector<8x128xf32>
    %382 = arith.divf %380, %381 : vector<8x128xf32>
    %383 = vector.extract_strided_slice %382 {offsets = [0, 0], sizes = [8, 64], strides = [1, 1]} : vector<8x128xf32> to vector<8x64xf32>
    %384 = vector.extract_strided_slice %382 {offsets = [0, 64], sizes = [8, 64], strides = [1, 1]} : vector<8x128xf32> to vector<8x64xf32>
    %385 = vector.extract_strided_slice %373 {offsets = [0, 128], sizes = [8, 64], strides = [1, 1]} : vector<8x192xf32> to vector<8x64xf32>
    %386 = vector.extract_strided_slice %374 {offsets = [0, 128], sizes = [8, 64], strides = [1, 1]} : vector<8x192xf32> to vector<8x64xf32>
    %387 = arith.addf %386, %210 : vector<8x64xf32>
    %388 = arith.mulf %383, %387 : vector<8x64xf32>
    %389 = arith.addf %385, %388 : vector<8x64xf32>
    %390 = math.tanh %389 : vector<8x64xf32>
    %391 = arith.subf %370, %390 : vector<8x64xf32>
    %392 = arith.mulf %384, %391 : vector<8x64xf32>
    %393 = arith.addf %390, %392 : vector<8x64xf32>
    %c56_148 = arith.constant 56 : index
    %c0_149 = arith.constant 0 : index
    %394 = vector.load %arg15[%c56_148, %c0_149] : memref<64x64xf32, #tpu.memory_space<vmem>>, vector<8x64xf32>
    tpu.vector_store %arg15[%c56_148, %c0_149], %393 {strides = array<i32>} : memref<64x64xf32, #tpu.memory_space<vmem>>, vector<8x64xf32>,
    %c0_150 = arith.constant 0 : index
    %c0_151 = arith.constant 0 : index
    %395 = vector.load %arg16[%c0_150, %c0_151] : memref<64x64xf32, #tpu.memory_space<vmem>>, vector<8x64xf32>
    tpu.vector_store %arg16[%c0_150, %c0_151], %393 {strides = array<i32>} : memref<64x64xf32, #tpu.memory_space<vmem>>, vector<8x64xf32>,
    %c0_152 = arith.constant 0 : index
    %c0_153 = arith.constant 0 : index
    %396 = vector.load %arg15[%c0_152, %c0_153] : memref<64x64xf32, #tpu.memory_space<vmem>>, vector<64x64xf32>
    %c0_154 = arith.constant 0 : index
    %c0_155 = arith.constant 0 : index
    %397 = vector.load %arg10[%c0_154, %c0_155] : memref<64x3xf32, #tpu.memory_space<vmem>>, vector<64x3xf32>
    %cst_156 = arith.constant dense<0.000000e+00> : vector<64x3xf32>
    %398 = tpu.matmul %396, %397, %cst_156 {dimension_numbers = #tpu.dot_dimension_numbers<[1], [0], [0], [1], [0, 0, 1, 1], [], []>} : vector<64x64xf32>, vector<64x3xf32>, vector<64x3xf32> -> vector<64x3xf32>
    %c0_157 = arith.constant 0 : index
    %c0_158 = arith.constant 0 : index
    %399 = vector.load %arg16[%c0_157, %c0_158] : memref<64x64xf32, #tpu.memory_space<vmem>>, vector<64x64xf32>
    %c0_159 = arith.constant 0 : index
    %c0_160 = arith.constant 0 : index
    %400 = vector.load %arg11[%c0_159, %c0_160] : memref<64x3xf32, #tpu.memory_space<vmem>>, vector<64x3xf32>
    %cst_161 = arith.constant dense<0.000000e+00> : vector<64x3xf32>
    %401 = tpu.matmul %399, %400, %cst_161 {dimension_numbers = #tpu.dot_dimension_numbers<[1], [0], [0], [1], [0, 0, 1, 1], [], []>} : vector<64x64xf32>, vector<64x3xf32>, vector<64x3xf32> -> vector<64x3xf32>
    %402 = arith.addf %398, %401 : vector<64x3xf32>
    %c0_162 = arith.constant 0 : index
    %c0_163 = arith.constant 0 : index
    %403 = vector.load %arg12[%c0_162, %c0_163] : memref<1x3xf32, #tpu.memory_space<vmem>>, vector<1x3xf32>
    %404 = vector.broadcast %403 : vector<1x3xf32> to vector<64x3xf32>
    %405 = arith.addf %402, %404 : vector<64x3xf32>
    %c0_164 = arith.constant 0 : index
    %c0_165 = arith.constant 0 : index
    %406 = vector.load %arg13[%c0_164, %c0_165] : memref<64x3xf32, #tpu.memory_space<vmem>>, vector<64x3xf32>
    tpu.vector_store %arg13[%c0_164, %c0_165], %405 {strides = array<i32>} : memref<64x3xf32, #tpu.memory_space<vmem>>, vector<64x3xf32>,
    return
  }
}

</mosaic_0001>

<bundles_post_ra>
// kernel: ppknet_forward.1
= control target key start
LH: loop header
LB: loop body
LE: loop exit
PB: predicated region body
PF: predicated region fallthrough
CT: control target
= control target key end

     0   :  { %v3179_v3 = vmov 0.0   ;;  %vm76_vm0 = vcmask 392192   ;;  %v66_v48 = vlaneseq  ;;  %vm215_vm1 = vcmask 523264   ;;  %s3180_s24 = smov 64   ;;  %s4023_s1 = inlined_call_operand.vmem [shape: f32[48,192], index: 1, kind: input, shape index: {}]   ;;  %s4024_s3 = inlined_call_operand.vmem [shape: f32[64,192], index: 3, kind: input, shape index: {}]   ;;  %s4025_s0 = inlined_call_operand.vmem [shape: f32[64,48], index: 0, kind: input, shape index: {}]   ;;  %s4026_s2 = inlined_call_operand.vmem [shape: f32[1,192], index: 2, kind: input, shape index: {}]   ;;  %s4027_s4 = inlined_call_operand.vmem [shape: f32[1,64], index: 4, kind: input, shape index: {}]   ;;  %s4028_s6 = inlined_call_operand.vmem [shape: f32[64,192], index: 6, kind: input, shape index: {}]   ;;  %s4029_s5 = inlined_call_operand.vmem [shape: f32[64,192], index: 5, kind: input, shape index: {}]   ;;  %s4030_s8 = inlined_call_operand.vmem [shape: f32[64,192], index: 8, kind: input, shape index: {}]   ;;  %s4031_s7 = inlined_call_operand.vmem [shape: f32[1,192], index: 7, kind: input, shape index: {}]   ;;  %s4032_s9 = inlined_call_operand.vmem [shape: f32[1,64], index: 9, kind: input, shape index: {}]   ;;  %s4033_s11 = inlined_call_operand.vmem [shape: f32[64,3], index: 11, kind: input, shape index: {}]   ;;  %s4034_s10 = inlined_call_operand.vmem [shape: f32[64,3], index: 10, kind: input, shape index: {}]   ;;  %s4035_s12 = inlined_call_operand.vmem [shape: f32[1,3], index: 12, kind: input, shape index: {}]   ;;  %s4036_s13 = inlined_call_operand.vmem [shape: f32[64,3], index: 13, kind: output, shape index: {}]  }
   0x1   :  { %v53_v0 = vld [vmem:[%s4023_s1 + $0x8] sm:$0xff]  ;;  %v55_v1 = vld [vmem:[%s4023_s1 + $0x18] sm:$0xff]  ;;  %v52_v2 = vld [vmem:[%s4023_s1] sm:$0xff]  ;;  %189 = vmatprep.mubr.f32.mxu1 %v3179_v3  ;;  %165 = vmatprep.mubr.f32.mxu0 %v3179_v3  ;;  %vm2545_vm2 = vcmask 23552  }
   0x2   :  { %v2719_v4 = vpack.c.bf16 %v55_v1, %v53_v0  ;;  %v54_v5 = vld [vmem:[%s4023_s1 + $0x10] sm:$0xff]  ;;  %v57_v6 = vld [vmem:[%s4023_s1 + $0x28] sm:$0xff]  ;;  %v59_v7 = vld [vmem:[%s4023_s1 + $0x38] sm:$0xff]  ;;  %v3406_v49 = vshrl.u32 %v66_v48, 7 }
   0x3   :  { %v2721_v8 = vpack.c.bf16 %v54_v5, %v52_v2  ;;  %v2723_v9 = vpack.c.bf16 %v59_v7, %v57_v6  ;;  %v56_v10 = vld [vmem:[%s4023_s1 + $0x20] sm:$0xff]  ;;  %v58_v11 = vld [vmem:[%s4023_s1 + $0x30] sm:$0xff]  ;;  %v61_v12 = vld [vmem:[%s4023_s1 + $0x48] sm:$0xff] }
   0x4   :  { %3051 = vmatprep.subr.bf16.mxu1 %v2719_v4  ;;  %2720 = vmatprep.subr.bf16.mxu0 %v2719_v4  ;;  %v63_v13 = vld [vmem:[%s4023_s1 + $0x58] sm:$0xff]  ;;  %v2725_v14 = vpack.c.bf16 %v58_v11, %v56_v10  ;;  %v60_v16 = vld [vmem:[%s4023_s1 + $0x40] sm:$0xff]  ;;  %v62_v17 = vld [vmem:[%s4023_s1 + $0x50] sm:$0xff]  ;;  %v72_v50 = vsub.s32 1, %v3406_v49  ;;  %v68_v62 = vsub.s32 0, %v3406_v49 }
   0x5   :  { %3054 = vmatpush1.bf16.msra.mxu1 %v2721_v8  ;;  %2722 = vmatpush1.bf16.msra.mxu0 %v2721_v8  ;;  %v2727_v15 = vpack.c.bf16 %v63_v13, %v61_v12  ;;  %v232_v18 = vld [vmem:[%s4024_s3 + $0x8] sm:$0xff]  ;;  %v234_v19 = vld [vmem:[%s4024_s3 + $0x18] sm:$0xff]  ;;  %v2729_v20 = vpack.c.bf16 %v62_v17, %v60_v16  ;;  %v231_v22 = vld [vmem:[%s4024_s3] sm:$0xff] }
   0x6   :  { %3052 = vmatprep.subr.bf16.mxu1 %v2723_v9  ;;  %2724 = vmatprep.subr.bf16.mxu0 %v2723_v9  ;;  %v3295_v21 = vpack.c.bf16 %v234_v19, %v232_v18  ;;  %v233_v23 = vld [vmem:[%s4024_s3 + $0x10] sm:$0xff]  ;;  %v236_v24 = vld [vmem:[%s4024_s3 + $0x28] sm:$0xff]  ;;  %v238_v25 = vld [vmem:[%s4024_s3 + $0x38] sm:$0xff] }
   0x7   :  { %v48_v26 = vld [vmem:[%s4025_s0 + $0x20] sm:$0xff]  ;;  %v3312_v27 = vpack.c.bf16 %v233_v23, %v231_v22  ;;  %v3318_v29 = vpack.c.bf16 %v238_v25, %v236_v24  ;;  %v237_v31 = vld [vmem:[%s4024_s3 + $0x30] sm:$0xff]  ;;  %v240_v32 = vld [vmem:[%s4024_s3 + $0x48] sm:$0xff] }
   0x8   :  { %v44_v28 = vld [vmem:[%s4025_s0] sm:$0xff]  ;;  %v242_v33 = vld [vmem:[%s4024_s3 + $0x58] sm:$0xff]  ;;  %v49_v34 = vld [vmem:[%s4025_s0 + $0x28] sm:$0xff] }
   0x9   :  { %3055 = vmatpush1.bf16.msra.mxu1 %v2725_v14  ;;  %2726 = vmatpush1.bf16.msra.mxu0 %v2725_v14  ;;  %v235_v30 = vld [vmem:[%s4024_s3 + $0x20] sm:$0xff]  ;;  %v3343_v36 = vpack.c.bf16 %v242_v33, %v240_v32  ;;  %v241_v38 = vld [vmem:[%s4024_s3 + $0x50] sm:$0xff]  ;;  %v244_v39 = vld [vmem:[%s4024_s3 + $0x68] sm:$0xff] }
   0xa   :  { %3053 = vmatprep.subr.bf16.mxu1 %v2727_v15  ;;  %2728 = vmatprep.subr.bf16.mxu0 %v2727_v15  ;;  %v3340_v35 = vpack.c.bf16 %v237_v31, %v235_v30  ;;  %v239_v37 = vld [vmem:[%s4024_s3 + $0x40] sm:$0xff]  ;;  %v246_v40 = vld [vmem:[%s4024_s3 + $0x78] sm:$0xff]  ;;  %v50_v41 = vld [vmem:[%s4025_s0 + $0x30] sm:$0xff] }
   0xb   :  { %v3366_v42 = vpack.c.bf16 %v241_v38, %v239_v37  ;;  %v3369_v43 = vpack.c.bf16 %v246_v40, %v244_v39  ;;  %v243_v44 = vld [vmem:[%s4024_s3 + $0x60] sm:$0xff]  ;;  %v245_v45 = vld [vmem:[%s4024_s3 + $0x70] sm:$0xff]  ;;  %v51_v46 = vld [vmem:[%s4025_s0 + $0x38] sm:$0xff] }
   0xc   :  { %v3385_v47 = vpack.c.bf16 %v245_v45, %v243_v44  ;;  %v64_v51 = vld [vmem:[%s4026_s2] sm:$0x3] }
   0xd   :  { %3056 = vmatpush1.bf16.msra.mxu1 %v2729_v20  ;;  %2730 = vmatpush1.bf16.msra.mxu0 %v2729_v20  ;;  %v3414_v52 = vrot.slane %v64_v51, %v72_v50  ;;  %v3432_v2 = vrot.slane %v64_v51, %v68_v62  ;;  %v3443_v14 = vld [vmem:[%s4027_s4] ss:$0 sm:$0xff]  ;;  %v45_v20 = vld [vmem:[%s4025_s0 + $0x8] sm:$0xff] }
   0xe   :  { %2732 = vmatprep.subr.bf16.mxu1 %v3295_v21  ;;  %2764 = vmatprep.subr.bf16.mxu0 %v3295_v21 }
  0x10   :  { %2562 = vmatmul.mubr.msk.f32.vlgmr.msra.gmra.mrb[0].mxu1 %vm76_vm0, %v48_v26  ;;  %2558 = vmatmul.mubr.msk.f32.vlgmr.msra.gmra.mrb[0].mxu0 %vm76_vm0, %v44_v28 }
  0x11   :  { %2734 = vmatpush1.bf16.msra.mxu1 %v3312_v27  ;;  %195 = vmatprep.mubr.f32.mxu1 %v3179_v3 }
  0x12   :  { %2736 = vmatprep.subr.bf16.mxu1 %v3318_v29  ;;  %171 = vmatprep.mubr.f32.mxu0 %v3179_v3 }
  0x13   :  { %2766 = vmatpush1.bf16.msra.mxu0 %v3312_v27 }
  0x14   :  { %2563 = vmatmul.mubr.msk.f32.gmra.mrb[2].mxu1 %vm76_vm0, %v49_v34  ;;  %2768 = vmatprep.subr.bf16.mxu0 %v3318_v29 }
  0x15   :  { %2738 = vmatpush1.bf16.msra.mxu1 %v3340_v35  ;;  %201 = vmatprep.mubr.f32.mxu1 %v3179_v3 }
  0x16   :  { %2740 = vmatprep.subr.bf16.mxu1 %v3343_v36  ;;  %2559 = vmatmul.mubr.msk.f32.gmra.mrb[2].mxu0 %vm76_vm0, %v45_v20 }
  0x17   :  { %2770 = vmatpush1.bf16.msra.mxu0 %v3340_v35  ;;  %177 = vmatprep.mubr.f32.mxu0 %v3179_v3 }
  0x18   :  { %2564 = vmatmul.mubr.msk.f32.gmra.mrb[4].mxu1 %vm76_vm0, %v50_v41  ;;  %2772 = vmatprep.subr.bf16.mxu0 %v3343_v36 }
  0x19   :  { %2742 = vmatpush1.bf16.msra.mxu1 %v3366_v42  ;;  %207 = vmatprep.mubr.f32.mxu1 %v3179_v3 }
  0x1a   :  { %2744 = vmatprep.subr.bf16.mxu1 %v3369_v43 }
  0x1b   :  { %2774 = vmatpush1.bf16.msra.mxu0 %v3366_v42 }
  0x1c   :  { %2565 = vmatmul.mubr.msk.f32.gmra.mrb[6].mxu1 %vm76_vm0, %v51_v46  ;;  %2776 = vmatprep.subr.bf16.mxu0 %v3369_v43 }
  0x1d   :  { %2746 = vmatpush1.bf16.msra.mxu1 %v3385_v47  ;;  %323 = vmatprep.mubr.f32.mxu1 %v3179_v3 }
  0x1e   :  { %2748 = vmatprep.subr.bf16.mxu1 %v3295_v21 }
  0x1f   :  { %2778 = vmatpush1.bf16.msra.mxu0 %v3385_v47 }
  0x20   :  { %324 = vmatmul.mubr.f32.vlgmr.msra.gmra.mrb[8].mxu1 %v3179_v3  ;;  %2796 = vmatprep.subr.bf16.mxu0 %v3295_v21 }
  0x21   :  { %2750 = vmatpush1.bf16.msra.mxu1 %v3312_v27  ;;  %423 = vmatprep.mubr.f32.mxu1 %v3179_v3 }
  0x22   :  { %2752 = vmatprep.subr.bf16.mxu1 %v3318_v29 }
  0x25   :  { %2754 = vmatpush1.bf16.msra.mxu1 %v3340_v35 }
  0x26   :  { %2756 = vmatprep.subr.bf16.mxu1 %v3343_v36 }
  0x29   :  { %2758 = vmatpush1.bf16.msra.mxu1 %v3366_v42 }
  0x2a   :  { %2760 = vmatprep.subr.bf16.mxu1 %v3369_v43 }
  0x2d   :  { %2762 = vmatpush1.bf16.msra.mxu1 %v3385_v47 }
  0x2e   :  { %2780 = vmatprep.subr.bf16.mxu1 %v3295_v21 }
  0xe3   :  { %v3416_v53 = vpop.f32.mrb[0].mxu1  ;;  %v167_v54 = vpop.f32.mrb[0].mxu0 }
  0xe4   :  { %v193_v55 = vpop.f32.mrb[1].mxu1  ;;  %v169_v56 = vpop.f32.mrb[1].mxu0  ;;  %v168_v5 = vadd.f32 %v167_v54, %v3432_v2  ;;  %v46_v54 = vld [vmem:[%s4025_s0 + $0x10] sm:$0xff] }
  0xe5   :  { %v194_v57 = vadd.f32 %v193_v55, %v3414_v52  ;;  %v170_v58 = vadd.f32 %v169_v56, %v3414_v52  ;;  %2560 = vmatmul.mubr.msk.f32.gmra.mrb[4].mxu0 %vm76_vm0, %v46_v54  ;;  %v47_v55 = vld [vmem:[%s4025_s0 + $0x18] sm:$0xff] }
  0xe6   :  { %183 = vmatprep.mubr.f32.mxu0 %v3179_v3 }
  0xe7   :  { %224 = vst.msk [vmem:[#allocation2 + $0x48] sm:$0xff] %vm215_vm1, %v194_v57  ;;  %v3421_v59 = vpop.f32.mrb[2].mxu1  ;;  %216 = vst.msk [vmem:[#allocation2 + $0x8] sm:$0xff] %vm215_vm1, %v170_v58 }
  0xe8   :  { %v199_v60 = vpop.f32.mrb[3].mxu1 }
  0xe9   :  { %v200_v61 = vadd.f32 %v199_v60, %v3414_v52  ;;  %v173_v26 = vpop.f32.mrb[2].mxu0  ;;  %2561 = vmatmul.mubr.msk.f32.gmra.mrb[6].mxu0 %vm76_vm0, %v47_v55 }
  0xea   :  { %v175_v28 = vpop.f32.mrb[3].mxu0  ;;  %v174_v33 = vadd.f32 %v173_v26, %v3432_v2  ;;  %523 = vmatprep.mubr.f32.mxu0 %v3179_v3 }
  0xeb   :  { %226 = vst.msk [vmem:[#allocation2 + $0x58] sm:$0xff] %vm215_vm1, %v200_v61  ;;  %v3427_v63 = vpop.f32.mrb[4].mxu1  ;;  %v176_v30 = vadd.f32 %v175_v28, %v3414_v52 }
  0xec   :  { %v205_v0 = vpop.f32.mrb[5].mxu1 }
  0xed   :  { %v206_v1 = vadd.f32 %v205_v0, %v3414_v52  ;;  %218 = vst.msk [vmem:[#allocation2 + $0x18] sm:$0xff] %vm215_vm1, %v176_v30 }
  0xee   :  { %v255_v18 = vld [vmem:[#allocation2 + $0x8] sm:$0xff] }
  0xef   :  { %228 = vst.msk [vmem:[#allocation2 + $0x68] sm:$0xff] %vm215_vm1, %v206_v1  ;;  %v3435_v4 = vpop.f32.mrb[6].mxu1 }
  0xf0   :  { %v211_v6 = vpop.f32.mrb[7].mxu1 }
  0xf1   :  { %v212_v7 = vadd.f32 %v211_v6, %v3414_v52 }
  0xf3   :  { %230 = vst.msk [vmem:[#allocation2 + $0x78] sm:$0xff] %vm215_vm1, %v212_v7  ;;  %v325_v8 = vpop.f32.mrb[8].mxu1 }
  0xf4   :  { %v330_v9 = vadd.f32 %v325_v8, %v168_v5  ;;  %v327_v10 = vpop.f32.mrb[9].mxu1  ;;  %v355_v48 = vld [vmem:[#allocation2 + $0x18] sm:$0xff] }
  0xf5   :  { %v337_v15 = vadd.f32 %v3443_v14, %v327_v10 }
  0xf6   :  { %v2567_v11 = vmul.f32 -1.442695, %v330_v9 }
  0xf8   :  { %3083 = vpow2.f32 %v2567_v11 }
 0x102   :  { %v3084_v12 = vpop.eup %3083 }
 0x103   :  { %v334_v13 = vadd.f32 1.0, %v3084_v12 }
 0x105   :  { %3085 = vrcp.f32 %v334_v13 }
 0x10f   :  { %v3086_v16 = vpop.eup %3085 }
 0x110   :  { %v338_v17 = vmul.f32 %v3086_v16, %v337_v15 }
 0x112   :  { %v339_v19 = vadd.f32 %v338_v17, %v255_v18 }
 0x114   :  { %3087 = vtanh.f32 %v339_v19 }
 0x11e   :  { %v3088_v22 = vpop.eup %3087 }
 0x11f   :  { %v341_v23 = vsub.f32 0.0, %v3088_v22 }
 0x121   :  { %343 = vrot.lane.b32.xlu0 %v341_v23, %s3180_s24 }
 0x193   :  { %v344_v24 = vpop.permute.xlu0 %343 }
 0x194   :  { %v346_v25 = vmul.f32 %v3086_v16, %v344_v24 }
 0x196   :  { %348 = vrot.lane.b32.xlu0 %v346_v25, %s3180_s24 }
 0x1b8   :  { %v179_v61 = vpop.f32.mrb[4].mxu0 }
 0x1b9   :  { %v181_v0 = vpop.f32.mrb[5].mxu0 }
 0x1ba   :  { %v182_v1 = vadd.f32 %v181_v0, %v3414_v52 }
 0x1bc   :  { %220 = vst.msk [vmem:[#allocation2 + $0x28] sm:$0xff] %vm215_vm1, %v182_v1  ;;  %v185_v5 = vpop.f32.mrb[6].mxu0 }
 0x1bd   :  { %v187_v6 = vpop.f32.mrb[7].mxu0 }
 0x1be   :  { %v188_v7 = vadd.f32 %v187_v6, %v3414_v52  ;;  %v180_v52 = vadd.f32 %v179_v61, %v3432_v2 }
 0x1c0   :  { %222 = vst.msk [vmem:[#allocation2 + $0x38] sm:$0xff] %vm215_vm1, %v188_v7 }
 0x1c3   :  { %v455_v20 = vld [vmem:[#allocation2 + $0x28] sm:$0xff] }
 0x208   :  { %v349_v31 = vpop.permute.xlu0 %348 }
 0x209   :  { %v351_v32 = vadd.f32 %v3088_v22, %v349_v31  ;;  %v186_v31 = vadd.f32 %v185_v5, %v3432_v2 }
 0x20b   :  { %352 = vst.msk [vmem:[#allocation3] sm:$0xff] %vm215_vm1, %v351_v32  ;;  %353 = vst.msk [vmem:[#allocation4 + $0x38] sm:$0xff] %vm215_vm1, %v351_v32  ;;  %2568 = vmatmul.mubr.msk.f32.vlgmr.msra.gmra.mrb[10].mxu1 %vm215_vm1, %v351_v32 }
 0x20c   :  { %2782 = vmatpush1.bf16.msra.mxu1 %v3312_v27  ;;  %623 = vmatprep.mubr.f32.mxu1 %v3179_v3 }
 0x20d   :  { %2784 = vmatprep.subr.bf16.mxu1 %v3318_v29 }
 0x210   :  { %2786 = vmatpush1.bf16.msra.mxu1 %v3340_v35 }
 0x211   :  { %2788 = vmatprep.subr.bf16.mxu1 %v3343_v36 }
 0x214   :  { %2790 = vmatpush1.bf16.msra.mxu1 %v3366_v42 }
 0x215   :  { %2792 = vmatprep.subr.bf16.mxu1 %v3369_v43 }
 0x218   :  { %2794 = vmatpush1.bf16.msra.mxu1 %v3385_v47 }
 0x219   :  { %2812 = vmatprep.subr.bf16.mxu1 %v3295_v21 }
 0x2de   :  { %v425_v34 = vpop.f32.mrb[10].mxu1 }
 0x2df   :  { %v430_v37 = vadd.f32 %v425_v34, %v174_v33  ;;  %v427_v38 = vpop.f32.mrb[11].mxu1 }
 0x2e0   :  { %v437_v44 = vadd.f32 %v3443_v14, %v427_v38 }
 0x2e1   :  { %v2569_v39 = vmul.f32 -1.442695, %v430_v37 }
 0x2e3   :  { %3089 = vpow2.f32 %v2569_v39 }
 0x2ed   :  { %v3090_v40 = vpop.eup %3089 }
 0x2ee   :  { %v434_v41 = vadd.f32 1.0, %v3090_v40 }
 0x2f0   :  { %3091 = vrcp.f32 %v434_v41 }
 0x2fa   :  { %v3092_v45 = vpop.eup %3091 }
 0x2fb   :  { %v438_v46 = vmul.f32 %v3092_v45, %v437_v44 }
 0x2fd   :  { %v439_v51 = vadd.f32 %v438_v46, %v355_v48 }
 0x2ff   :  { %3093 = vtanh.f32 %v439_v51 }
 0x309   :  { %v3094_v56 = vpop.eup %3093 }
 0x30a   :  { %v441_v57 = vsub.f32 %v351_v32, %v3094_v56 }
 0x30c   :  { %443 = vrot.lane.b32.xlu1 %v441_v57, %s3180_s24  ;;  %v192_v57 = vadd.f32 %v3416_v53, %v3432_v2 }
 0x37e   :  { %v444_v58 = vpop.permute.xlu1 %443 }
 0x37f   :  { %v446_v60 = vmul.f32 %v3092_v45, %v444_v58  ;;  %v555_v45 = vld [vmem:[#allocation2 + $0x38] sm:$0xff] }
 0x381   :  { %448 = vrot.lane.b32.xlu1 %v446_v60, %s3180_s24 }
 0x3f3   :  { %v449_v8 = vpop.permute.xlu1 %448 }
 0x3f4   :  { %v451_v9 = vadd.f32 %v3094_v56, %v449_v8 }
 0x3f6   :  { %452 = vst.msk [vmem:[#allocation3 + $0x8] sm:$0xff] %vm215_vm1, %v451_v9  ;;  %453 = vst.msk [vmem:[#allocation4 + $0x30] sm:$0xff] %vm215_vm1, %v451_v9  ;;  %2570 = vmatmul.mubr.msk.f32.vlgmr.msra.gmra.mrb[8].mxu0 %vm215_vm1, %v451_v9 }
 0x3f7   :  { %2798 = vmatpush1.bf16.msra.mxu0 %v3312_v27  ;;  %723 = vmatprep.mubr.f32.mxu0 %v3179_v3 }
 0x3f8   :  { %2800 = vmatprep.subr.bf16.mxu0 %v3318_v29 }
 0x3fb   :  { %2802 = vmatpush1.bf16.msra.mxu0 %v3340_v35 }
 0x3fc   :  { %2804 = vmatprep.subr.bf16.mxu0 %v3343_v36 }
 0x3ff   :  { %2806 = vmatpush1.bf16.msra.mxu0 %v3366_v42 }
 0x400   :  { %2808 = vmatprep.subr.bf16.mxu0 %v3369_v43 }
 0x403   :  { %2810 = vmatpush1.bf16.msra.mxu0 %v3385_v47 }
 0x404   :  { %2828 = vmatprep.subr.bf16.mxu0 %v3295_v21 }
 0x4c9   :  { %v525_v10 = vpop.f32.mrb[8].mxu0 }
 0x4ca   :  { %v530_v11 = vadd.f32 %v525_v10, %v180_v52  ;;  %v527_v12 = vpop.f32.mrb[9].mxu0 }
 0x4cb   :  { %v537_v17 = vadd.f32 %v3443_v14, %v527_v12 }
 0x4cc   :  { %v2571_v13 = vmul.f32 -1.442695, %v530_v11 }
 0x4ce   :  { %3095 = vpow2.f32 %v2571_v13 }
 0x4d8   :  { %v3096_v15 = vpop.eup %3095 }
 0x4d9   :  { %v534_v16 = vadd.f32 1.0, %v3096_v15 }
 0x4db   :  { %3097 = vrcp.f32 %v534_v16  ;;  %v198_v16 = vadd.f32 %v3421_v59, %v3432_v2 }
 0x4e5   :  { %v3098_v18 = vpop.eup %3097 }
 0x4e6   :  { %v538_v19 = vmul.f32 %v3098_v18, %v537_v17 }
 0x4e8   :  { %v539_v22 = vadd.f32 %v538_v19, %v455_v20 }
 0x4ea   :  { %3099 = vtanh.f32 %v539_v22 }
 0x4f4   :  { %v3100_v23 = vpop.eup %3099 }
 0x4f5   :  { %v541_v24 = vsub.f32 %v451_v9, %v3100_v23  ;;  %v655_v9 = vld [vmem:[#allocation2 + $0x48] sm:$0xff] }
 0x4f7   :  { %543 = vrot.lane.b32.xlu0 %v541_v24, %s3180_s24 }
 0x569   :  { %v544_v25 = vpop.permute.xlu0 %543 }
 0x56a   :  { %v546_v26 = vmul.f32 %v3098_v18, %v544_v25 }
 0x56c   :  { %548 = vrot.lane.b32.xlu1 %v546_v26, %s3180_s24 }
 0x5de   :  { %v549_v28 = vpop.permute.xlu1 %548 }
 0x5df   :  { %v551_v30 = vadd.f32 %v3100_v23, %v549_v28  ;;  %v204_v28 = vadd.f32 %v3427_v63, %v3432_v2 }
 0x5e1   :  { %552 = vst.msk [vmem:[#allocation3 + $0x10] sm:$0xff] %vm215_vm1, %v551_v30  ;;  %553 = vst.msk [vmem:[#allocation4 + $0x28] sm:$0xff] %vm215_vm1, %v551_v30  ;;  %2572 = vmatmul.mubr.msk.f32.vlgmr.msra.gmra.mrb[12].mxu1 %vm215_vm1, %v551_v30 }
 0x5e2   :  { %2814 = vmatpush1.bf16.msra.mxu1 %v3312_v27  ;;  %823 = vmatprep.mubr.f32.mxu1 %v3179_v3 }
 0x5e3   :  { %2816 = vmatprep.subr.bf16.mxu1 %v3318_v29 }
 0x5e6   :  { %2818 = vmatpush1.bf16.msra.mxu1 %v3340_v35 }
 0x5e7   :  { %2820 = vmatprep.subr.bf16.mxu1 %v3343_v36 }
 0x5ea   :  { %2822 = vmatpush1.bf16.msra.mxu1 %v3366_v42 }
 0x5eb   :  { %2824 = vmatprep.subr.bf16.mxu1 %v3369_v43 }
 0x5ee   :  { %2826 = vmatpush1.bf16.msra.mxu1 %v3385_v47 }
 0x5ef   :  { %2844 = vmatprep.subr.bf16.mxu1 %v3295_v21 }
 0x6b4   :  { %v625_v32 = vpop.f32.mrb[12].mxu1 }
 0x6b5   :  { %v630_v33 = vadd.f32 %v625_v32, %v186_v31  ;;  %v627_v34 = vpop.f32.mrb[13].mxu1 }
 0x6b6   :  { %v637_v40 = vadd.f32 %v3443_v14, %v627_v34 }
 0x6b7   :  { %v2573_v37 = vmul.f32 -1.442695, %v630_v33 }
 0x6b9   :  { %3101 = vpow2.f32 %v2573_v37 }
 0x6c3   :  { %v3102_v38 = vpop.eup %3101 }
 0x6c4   :  { %v634_v39 = vadd.f32 1.0, %v3102_v38 }
 0x6c6   :  { %3103 = vrcp.f32 %v634_v39 }
 0x6d0   :  { %v3104_v41 = vpop.eup %3103 }
 0x6d1   :  { %v638_v44 = vmul.f32 %v3104_v41, %v637_v40 }
 0x6d3   :  { %v639_v46 = vadd.f32 %v638_v44, %v555_v45 }
 0x6d5   :  { %3105 = vtanh.f32 %v639_v46 }
 0x6df   :  { %v3106_v48 = vpop.eup %3105 }
 0x6e0   :  { %v641_v51 = vsub.f32 %v551_v30, %v3106_v48 }
 0x6e2   :  { %643 = vrot.lane.b32.xlu0 %v641_v51, %s3180_s24 }
 0x754   :  { %v644_v21 = vpop.permute.xlu0 %643 }
 0x755   :  { %v646_v54 = vmul.f32 %v3104_v41, %v644_v21  ;;  %v855_v41 = vld [vmem:[#allocation2 + $0x68] sm:$0xff] }
 0x757   :  { %648 = vrot.lane.b32.xlu1 %v646_v54, %s3180_s24  ;;  %v210_v54 = vadd.f32 %v3435_v4, %v3432_v2  ;;  %v1089_v2 = vld [vmem:[%s4028_s6 + $0x18] sm:$0xff]  ;;  %v1086_v4 = vld [vmem:[%s4028_s6] sm:$0xff] }
 0x7c9   :  { %v649_v55 = vpop.permute.xlu1 %648 }
 0x7ca   :  { %v651_v56 = vadd.f32 %v3106_v48, %v649_v55 }
 0x7cc   :  { %652 = vst.msk [vmem:[#allocation3 + $0x18] sm:$0xff] %vm215_vm1, %v651_v56  ;;  %653 = vst.msk [vmem:[#allocation4 + $0x20] sm:$0xff] %vm215_vm1, %v651_v56  ;;  %2574 = vmatmul.mubr.msk.f32.vlgmr.msra.gmra.mrb[10].mxu0 %vm215_vm1, %v651_v56 }
 0x7cd   :  { %2830 = vmatpush1.bf16.msra.mxu0 %v3312_v27  ;;  %923 = vmatprep.mubr.f32.mxu0 %v3179_v3 }
 0x7ce   :  { %2832 = vmatprep.subr.bf16.mxu0 %v3318_v29 }
 0x7d1   :  { %2834 = vmatpush1.bf16.msra.mxu0 %v3340_v35 }
 0x7d2   :  { %2836 = vmatprep.subr.bf16.mxu0 %v3343_v36 }
 0x7d5   :  { %2838 = vmatpush1.bf16.msra.mxu0 %v3366_v42 }
 0x7d6   :  { %2840 = vmatprep.subr.bf16.mxu0 %v3369_v43 }
 0x7d9   :  { %2842 = vmatpush1.bf16.msra.mxu0 %v3385_v47 }
 0x89f   :  { %v725_v58 = vpop.f32.mrb[10].mxu0 }
 0x8a0   :  { %v730_v60 = vadd.f32 %v725_v58, %v192_v57  ;;  %v727_v61 = vpop.f32.mrb[11].mxu0 }
 0x8a1   :  { %v737_v6 = vadd.f32 %v3443_v14, %v727_v61 }
 0x8a2   :  { %v2575_v0 = vmul.f32 -1.442695, %v730_v60 }
 0x8a4   :  { %3107 = vpow2.f32 %v2575_v0 }
 0x8ae   :  { %v3108_v1 = vpop.eup %3107 }
 0x8af   :  { %v734_v5 = vadd.f32 1.0, %v3108_v1 }
 0x8b1   :  { %3109 = vrcp.f32 %v734_v5 }
 0x8bb   :  { %v3110_v7 = vpop.eup %3109 }
 0x8bc   :  { %v738_v8 = vmul.f32 %v3110_v7, %v737_v6  ;;  %v955_v6 = vld [vmem:[#allocation2 + $0x78] sm:$0xff] }
 0x8be   :  { %v739_v52 = vadd.f32 %v738_v8, %v655_v9  ;;  %v1087_v8 = vld [vmem:[%s4028_s6 + $0x8] sm:$0xff] }
 0x8bf   :  { %v2859_v9 = vpack.c.bf16 %v1089_v2, %v1087_v8  ;;  %v1069_v8 = vld [vmem:[%s4029_s5 + $0x38] sm:$0xff] }
 0x8c0   :  { %3111 = vtanh.f32 %v739_v52  ;;  %v1091_v52 = vld [vmem:[%s4028_s6 + $0x28] sm:$0xff] }
 0x8c1   :  { %2860 = vmatprep.subr.bf16.mxu0 %v2859_v9  ;;  %v1066_v9 = vld [vmem:[%s4029_s5 + $0x20] sm:$0xff] }
 0x8ca   :  { %v3112_v10 = vpop.eup %3111 }
 0x8cb   :  { %v741_v11 = vsub.f32 %v651_v56, %v3112_v10 }
 0x8cd   :  { %743 = vrot.lane.b32.xlu0 %v741_v11, %s3180_s24 }
 0x93f   :  { %v744_v53 = vpop.permute.xlu0 %743 }
 0x940   :  { %v746_v12 = vmul.f32 %v3110_v7, %v744_v53 }
 0x942   :  { %748 = vrot.lane.b32.xlu1 %v746_v12, %s3180_s24  ;;  %v1090_v12 = vld [vmem:[%s4028_s6 + $0x20] sm:$0xff] }
 0x9b4   :  { %v749_v13 = vpop.permute.xlu1 %748 }
 0x9b5   :  { %v751_v15 = vadd.f32 %v3112_v10, %v749_v13  ;;  %v1093_v10 = vld [vmem:[%s4028_s6 + $0x38] sm:$0xff]  ;;  %v1092_v13 = vld [vmem:[%s4028_s6 + $0x30] sm:$0xff] }
 0x9b6   :  { %v2863_v53 = vpack.c.bf16 %v1093_v10, %v1091_v52  ;;  %v1071_v10 = vld [vmem:[%s4029_s5 + $0x48] sm:$0xff] }
 0x9b7   :  { %752 = vst.msk [vmem:[#allocation3 + $0x20] sm:$0xff] %vm215_vm1, %v751_v15  ;;  %753 = vst.msk [vmem:[#allocation4 + $0x18] sm:$0xff] %vm215_vm1, %v751_v15  ;;  %2576 = vmatmul.mubr.msk.f32.vlgmr.msra.gmra.mrb[14].mxu1 %vm215_vm1, %v751_v15 }
 0x9b8   :  { %2846 = vmatpush1.bf16.msra.mxu1 %v3312_v27  ;;  %1023 = vmatprep.mubr.f32.mxu1 %v3179_v3 }
 0x9b9   :  { %2848 = vmatprep.subr.bf16.mxu1 %v3318_v29 }
 0x9bc   :  { %2850 = vmatpush1.bf16.msra.mxu1 %v3340_v35 }
 0x9bd   :  { %2852 = vmatprep.subr.bf16.mxu1 %v3343_v36 }
 0x9c0   :  { %2854 = vmatpush1.bf16.msra.mxu1 %v3366_v42  ;;  %v755_v42 = vld [vmem:[#allocation2 + $0x58] sm:$0xff] }
 0x9c1   :  { %2856 = vmatprep.subr.bf16.mxu1 %v3369_v43 }
 0x9c4   :  { %2858 = vmatpush1.bf16.msra.mxu1 %v3385_v47 }
 0xa8a   :  { %v825_v17 = vpop.f32.mrb[14].mxu1 }
 0xa8b   :  { %v830_v18 = vadd.f32 %v825_v17, %v198_v16  ;;  %v827_v27 = vpop.f32.mrb[15].mxu1 }
 0xa8c   :  { %v837_v35 = vadd.f32 %v3443_v14, %v827_v27  ;;  %v1097_v27 = vld [vmem:[%s4028_s6 + $0x58] sm:$0xff] }
 0xa8d   :  { %v2577_v19 = vmul.f32 -1.442695, %v830_v18  ;;  %v1095_v18 = vld [vmem:[%s4028_s6 + $0x48] sm:$0xff] }
 0xa8f   :  { %3113 = vpow2.f32 %v2577_v19  ;;  %v2867_v19 = vpack.c.bf16 %v1097_v27, %v1095_v18  ;;  %v1077_v18 = vld [vmem:[%s4029_s5 + $0x78] sm:$0xff] }
 0xa99   :  { %v3114_v20 = vpop.eup %3113 }
 0xa9a   :  { %v834_v29 = vadd.f32 1.0, %v3114_v20  ;;  %v1094_v20 = vld [vmem:[%s4028_s6 + $0x40] sm:$0xff] }
 0xa9c   :  { %3115 = vrcp.f32 %v834_v29  ;;  %v1096_v29 = vld [vmem:[%s4028_s6 + $0x50] sm:$0xff] }
 0xaa6   :  { %v3116_v36 = vpop.eup %3115 }
 0xaa7   :  { %v838_v22 = vmul.f32 %v3116_v36, %v837_v35  ;;  %v2869_v35 = vpack.c.bf16 %v1096_v29, %v1094_v20  ;;  %v1074_v20 = vld [vmem:[%s4029_s5 + $0x60] sm:$0xff]  ;;  %v1076_v29 = vld [vmem:[%s4029_s5 + $0x70] sm:$0xff] }
 0xaa9   :  { %v839_v23 = vadd.f32 %v838_v22, %v755_v42  ;;  %v1101_v22 = vld [vmem:[%s4028_s6 + $0x78] sm:$0xff]  ;;  %v1098_v42 = vld [vmem:[%s4028_s6 + $0x60] sm:$0xff] }
 0xaab   :  { %3117 = vtanh.f32 %v839_v23 }
 0xab5   :  { %v3118_v43 = vpop.eup %3117 }
 0xab6   :  { %v841_v47 = vsub.f32 %v751_v15, %v3118_v43  ;;  %v2865_v15 = vpack.c.bf16 %v1092_v13, %v1090_v12  ;;  %v1070_v13 = vld [vmem:[%s4029_s5 + $0x40] sm:$0xff] }
 0xab8   :  { %843 = vrot.lane.b32.xlu0 %v841_v47, %s3180_s24 }
 0xb2a   :  { %v844_v59 = vpop.permute.xlu0 %843 }
 0xb2b   :  { %v846_v24 = vmul.f32 %v3116_v36, %v844_v59  ;;  %v1099_v36 = vld [vmem:[%s4028_s6 + $0x68] sm:$0xff] }
 0xb2c   :  { %v2871_v23 = vpack.c.bf16 %v1101_v22, %v1099_v36  ;;  %v2889_v36 = vpack.c.bf16 %v1076_v29, %v1074_v20  ;;  %v1081_v22 = vld [vmem:[#allocation4 + $0x18] sm:$0xff] }
 0xb2d   :  { %848 = vrot.lane.b32.xlu1 %v846_v24, %s3180_s24 }
 0xb9f   :  { %v849_v25 = vpop.permute.xlu1 %848 }
 0xba0   :  { %v851_v26 = vadd.f32 %v3118_v43, %v849_v25  ;;  %v1100_v43 = vld [vmem:[%s4028_s6 + $0x70] sm:$0xff]  ;;  %v1063_v25 = vld [vmem:[%s4029_s5 + $0x8] sm:$0xff] }
 0xba1   :  { %v2873_v47 = vpack.c.bf16 %v1100_v43, %v1098_v42  ;;  %v1082_v42 = vld [vmem:[#allocation4 + $0x20] sm:$0xff]  ;;  %v1084_v43 = vld [vmem:[#allocation4 + $0x30] sm:$0xff] }
 0xba2   :  { %852 = vst.msk [vmem:[#allocation3 + $0x28] sm:$0xff] %vm215_vm1, %v851_v26  ;;  %853 = vst.msk [vmem:[#allocation4 + $0x10] sm:$0xff] %vm215_vm1, %v851_v26  ;;  %2578 = vmatmul.mubr.msk.f32.vlgmr.msra.gmra.mrb[12].mxu0 %vm215_vm1, %v851_v26 }
 0xba3   :  { %1190 = vmatprep.mubr.f32.mxu0 %v3179_v3 }
 0xc75   :  { %v925_v30 = vpop.f32.mrb[12].mxu0 }
 0xc76   :  { %v930_v31 = vadd.f32 %v925_v30, %v204_v28  ;;  %v927_v32 = vpop.f32.mrb[13].mxu0  ;;  %v1421_v30 = vld [vmem:[%s4030_s8 + $0x8] sm:$0xff] }
 0xc77   :  { %v937_v38 = vadd.f32 %v3443_v14, %v927_v32 }
 0xc78   :  { %v2579_v33 = vmul.f32 -1.442695, %v930_v31  ;;  %v1423_v31 = vld [vmem:[%s4030_s8 + $0x18] sm:$0xff] }
 0xc79   :  { %v3630_v32 = vpack.c.bf16 %v1423_v31, %v1421_v30  ;;  %v1059_v30 = vld [vmem:[#allocation3 + $0x28] sm:$0xff] }
 0xc7a   :  { %3119 = vpow2.f32 %v2579_v33  ;;  %v1420_v33 = vld [vmem:[%s4030_s8] sm:$0xff] }
 0xc7b   :  { %2892 = vmatprep.subr.bf16.mxu1 %v3630_v32 }
 0xc84   :  { %v3120_v34 = vpop.eup %3119 }
 0xc85   :  { %v934_v37 = vadd.f32 1.0, %v3120_v34  ;;  %v1422_v34 = vld [vmem:[%s4030_s8 + $0x10] sm:$0xff] }
 0xc87   :  { %3121 = vrcp.f32 %v934_v37  ;;  %v3638_v37 = vpack.c.bf16 %v1422_v34, %v1420_v33 }
 0xc91   :  { %v3122_v39 = vpop.eup %3121 }
 0xc92   :  { %v938_v40 = vmul.f32 %v3122_v39, %v937_v38  ;;  %v1425_v38 = vld [vmem:[%s4030_s8 + $0x28] sm:$0xff] }
 0xc94   :  { %v939_v44 = vadd.f32 %v938_v40, %v855_v41  ;;  %v1424_v41 = vld [vmem:[%s4030_s8 + $0x20] sm:$0xff] }
 0xc96   :  { %3123 = vtanh.f32 %v939_v44  ;;  %v1426_v44 = vld [vmem:[%s4030_s8 + $0x30] sm:$0xff] }
 0xca0   :  { %v3124_v45 = vpop.eup %3123 }
 0xca1   :  { %v941_v46 = vsub.f32 %v851_v26, %v3124_v45  ;;  %v1065_v26 = vld [vmem:[%s4029_s5 + $0x18] sm:$0xff] }
 0xca2   :  { %v2875_v28 = vpack.c.bf16 %v1065_v26, %v1063_v25  ;;  %v1056_v25 = vld [vmem:[#allocation3 + $0x10] sm:$0xff]  ;;  %v1057_v26 = vld [vmem:[#allocation3 + $0x18] sm:$0xff] }
 0xca3   :  { %943 = vrot.lane.b32.xlu0 %v941_v46, %s3180_s24  ;;  %v1429_v46 = vld [vmem:[%s4030_s8 + $0x48] sm:$0xff] }
 0xd15   :  { %v944_v63 = vpop.permute.xlu0 %943 }
 0xd16   :  { %v946_v48 = vmul.f32 %v3122_v39, %v944_v63  ;;  %v1427_v39 = vld [vmem:[%s4030_s8 + $0x38] sm:$0xff] }
 0xd17   :  { %v3648_v40 = vpack.c.bf16 %v1427_v39, %v1425_v38  ;;  %v1431_v63 = vld [vmem:[%s4030_s8 + $0x58] sm:$0xff]  ;;  %v1376_v39 = vld [vmem:[%s4031_s7] sm:$0x3] }
 0xd18   :  { %948 = vrot.lane.b32.xlu1 %v946_v48, %s3180_s24  ;;  %v3666_v48 = vpack.c.bf16 %v1431_v63, %v1429_v46 }
 0xd8a   :  { %v949_v51 = vpop.permute.xlu1 %948 }
 0xd8b   :  { %v951_v21 = vadd.f32 %v3124_v45, %v949_v51  ;;  %v3656_v45 = vpack.c.bf16 %v1426_v44, %v1424_v41  ;;  %v1428_v51 = vld [vmem:[%s4030_s8 + $0x40] sm:$0xff]  ;;  %v1381_v41 = vrot.slane %v1376_v39, %v68_v62  ;;  %v1385_v44 = vrot.slane %v1376_v39, %v72_v50 }
 0xd8d   :  { %952 = vst.msk [vmem:[#allocation3 + $0x30] sm:$0xff] %vm215_vm1, %v951_v21  ;;  %953 = vst.msk [vmem:[#allocation4 + $0x8] sm:$0xff] %vm215_vm1, %v951_v21  ;;  %2580 = vmatmul.mubr.msk.f32.vlgmr.msra.gmra.mrb[16].mxu1 %vm215_vm1, %v951_v21 }
 0xd8e   :  { %1509 = vmatprep.mubr.f32.mxu1 %v3179_v3  ;;  %2894 = vmatpush1.bf16.msra.mxu1 %v3638_v37 }
 0xd8f   :  { %2896 = vmatprep.subr.bf16.mxu1 %v3648_v40 }
 0xd92   :  { %2898 = vmatpush1.bf16.msra.mxu1 %v3656_v45 }
 0xd93   :  { %2900 = vmatprep.subr.bf16.mxu1 %v3666_v48 }
 0xd94   :  { %v1060_v31 = vld [vmem:[#allocation3 + $0x30] sm:$0xff] }
 0xe60   :  { %v1025_v55 = vpop.f32.mrb[16].mxu1 }
 0xe61   :  { %v1030_v56 = vadd.f32 %v1025_v55, %v210_v54  ;;  %v1027_v57 = vpop.f32.mrb[17].mxu1  ;;  %v1433_v55 = vld [vmem:[%s4030_s8 + $0x68] sm:$0xff] }
 0xe62   :  { %v1037_v0 = vadd.f32 %v3443_v14, %v1027_v57  ;;  %v1088_v14 = vld [vmem:[%s4028_s6 + $0x10] sm:$0xff] }
 0xe63   :  { %v2581_v58 = vmul.f32 -1.442695, %v1030_v56  ;;  %v2861_v11 = vpack.c.bf16 %v1088_v14, %v1086_v4  ;;  %v1435_v56 = vld [vmem:[%s4030_s8 + $0x78] sm:$0xff]  ;;  %v1068_v14 = vld [vmem:[%s4029_s5 + $0x30] sm:$0xff] }
 0xe64   :  { %v3684_v57 = vpack.c.bf16 %v1435_v56, %v1433_v55 }
 0xe65   :  { %3125 = vpow2.f32 %v2581_v58  ;;  %2862 = vmatpush1.bf16.msra.mxu0 %v2861_v11  ;;  %v1432_v58 = vld [vmem:[%s4030_s8 + $0x60] sm:$0xff]  ;;  %v1073_v11 = vld [vmem:[%s4029_s5 + $0x58] sm:$0xff] }
 0xe66   :  { %2864 = vmatprep.subr.bf16.mxu0 %v2863_v53  ;;  %v2881_v53 = vpack.c.bf16 %v1068_v14, %v1066_v9  ;;  %v2883_v12 = vpack.c.bf16 %v1073_v11, %v1071_v10 }
 0xe69   :  { %2866 = vmatpush1.bf16.msra.mxu0 %v2865_v15  ;;  %v1072_v15 = vld [vmem:[%s4029_s5 + $0x50] sm:$0xff] }
 0xe6a   :  { %2868 = vmatprep.subr.bf16.mxu0 %v2867_v19  ;;  %v2885_v27 = vpack.c.bf16 %v1072_v15, %v1070_v13 }
 0xe6d   :  { %2870 = vmatpush1.bf16.msra.mxu0 %v2869_v35  ;;  %v1080_v35 = vld [vmem:[#allocation4 + $0x10] sm:$0xff] }
 0xe6e   :  { %2872 = vmatprep.subr.bf16.mxu0 %v2871_v23  ;;  %v1083_v23 = vld [vmem:[#allocation4 + $0x28] sm:$0xff] }
 0xe6f   :  { %v3126_v60 = vpop.eup %3125 }
 0xe70   :  { %v1034_v61 = vadd.f32 1.0, %v3126_v60  ;;  %v1434_v60 = vld [vmem:[%s4030_s8 + $0x70] sm:$0xff] }
 0xe71   :  { %2874 = vmatpush1.bf16.msra.mxu0 %v2873_v47  ;;  %v1085_v47 = vld [vmem:[#allocation4 + $0x38] sm:$0xff] }
 0xe72   :  { %3127 = vrcp.f32 %v1034_v61  ;;  %2876 = vmatprep.subr.bf16.mxu0 %v2875_v28  ;;  %v3692_v61 = vpack.c.bf16 %v1434_v60, %v1432_v58  ;;  %v1058_v28 = vld [vmem:[#allocation3 + $0x20] sm:$0xff] }
 0xe7c   :  { %v3128_v1 = vpop.eup %3127 }
 0xe7d   :  { %v1038_v5 = vmul.f32 %v3128_v1, %v1037_v0 }
 0xe7f   :  { %v1039_v7 = vadd.f32 %v1038_v5, %v955_v6  ;;  %v1062_v5 = vld [vmem:[%s4029_s5] sm:$0xff]  ;;  %v1064_v6 = vld [vmem:[%s4029_s5 + $0x10] sm:$0xff] }
 0xe80   :  { %v2877_v2 = vpack.c.bf16 %v1064_v6, %v1062_v5 }
 0xe81   :  { %3129 = vtanh.f32 %v1039_v7  ;;  %v1067_v7 = vld [vmem:[%s4029_s5 + $0x28] sm:$0xff] }
 0xe82   :  { %v2879_v4 = vpack.c.bf16 %v1069_v8, %v1067_v7 }
 0xe8b   :  { %v3589_v16 = vpop.eup %3129 }
 0xe8c   :  { %v1041_v17 = vsub.f32 %v951_v21, %v3589_v16  ;;  %v1430_v21 = vld [vmem:[%s4030_s8 + $0x50] sm:$0xff] }
 0xe8d   :  { %v3674_v54 = vpack.c.bf16 %v1430_v21, %v1428_v51 }
 0xe8e   :  { %1043 = vrot.lane.b32.xlu0 %v1041_v17, %s3180_s24  ;;  %v1075_v17 = vld [vmem:[%s4029_s5 + $0x68] sm:$0xff] }
 0xe8f   :  { %2902 = vmatpush1.bf16.msra.mxu1 %v3674_v54  ;;  %v2887_v19 = vpack.c.bf16 %v1077_v18, %v1075_v17 }
 0xe90   :  { %2904 = vmatprep.subr.bf16.mxu1 %v3684_v57 }
 0xe93   :  { %2906 = vmatpush1.bf16.msra.mxu1 %v3692_v61 }
 0xe94   :  { %2908 = vmatprep.subr.bf16.mxu1 %v3630_v32 }
 0xe96   :  { %1510 = vmatmul.mubr.f32.vlgmr.msra.gmra.mrb[18].mxu1 %v3179_v3 }
 0xe97   :  { %2910 = vmatpush1.bf16.msra.mxu1 %v3638_v37  ;;  %1609 = vmatprep.mubr.f32.mxu1 %v3179_v3 }
 0xe98   :  { %2912 = vmatprep.subr.bf16.mxu1 %v3648_v40 }
 0xe9b   :  { %2914 = vmatpush1.bf16.msra.mxu1 %v3656_v45 }
 0xe9c   :  { %2916 = vmatprep.subr.bf16.mxu1 %v3666_v48 }
 0xe9f   :  { %2918 = vmatpush1.bf16.msra.mxu1 %v3674_v54 }
 0xea0   :  { %2920 = vmatprep.subr.bf16.mxu1 %v3684_v57 }
 0xea3   :  { %2922 = vmatpush1.bf16.msra.mxu1 %v3692_v61 }
 0xea4   :  { %2924 = vmatprep.subr.bf16.mxu1 %v3630_v32 }
 0xf00   :  { %v1044_v59 = vpop.permute.xlu0 %1043 }
 0xf01   :  { %v1046_v24 = vmul.f32 %v3128_v1, %v1044_v59  ;;  %v1054_v59 = vld [vmem:[#allocation3] sm:$0xff] }
 0xf03   :  { %1048 = vrot.lane.b32.xlu1 %v1046_v24, %s3180_s24  ;;  %v1055_v24 = vld [vmem:[#allocation3 + $0x8] sm:$0xff] }
 0xf69   :  { %v1511_v34 = vpop.f32.mrb[18].mxu1 }
 0xf6a   :  { %v1513_v38 = vpop.f32.mrb[19].mxu1 }
 0xf75   :  { %v1049_v0 = vpop.permute.xlu1 %1048 }
 0xf76   :  { %v1051_v1 = vadd.f32 %v3589_v16, %v1049_v0  ;;  %v1079_v16 = vld [vmem:[#allocation4 + $0x8] sm:$0xff] }
 0xf78   :  { %1052 = vst.msk [vmem:[#allocation3 + $0x38] sm:$0xff] %vm215_vm1, %v1051_v1  ;;  %1053 = vst.msk [vmem:[#allocation4] sm:$0xff] %vm215_vm1, %v1051_v1 }
 0xf7f   :  { %v1078_v52 = vld [vmem:[#allocation4] sm:$0xff]  ;;  %v1061_v33 = vld [vmem:[#allocation3 + $0x38] sm:$0xff] }
 0xf80   :  { %2582 = vmatmul.mubr.msk.f32.vlgmr.msra.gmra.mrb[14].mxu0 %vm215_vm1, %v1078_v52 }
 0xf81   :  { %2878 = vmatpush1.bf16.msra.mxu0 %v2877_v2  ;;  %1196 = vmatprep.mubr.f32.mxu0 %v3179_v3 }
 0xf82   :  { %2880 = vmatprep.subr.bf16.mxu0 %v2879_v4 }
 0xf84   :  { %2583 = vmatmul.mubr.msk.f32.gmra.mrb[16].mxu0 %vm215_vm1, %v1079_v16 }
 0xf85   :  { %1202 = vmatprep.mubr.f32.mxu0 %v3179_v3  ;;  %2882 = vmatpush1.bf16.msra.mxu0 %v2881_v53 }
 0xf86   :  { %2884 = vmatprep.subr.bf16.mxu0 %v2883_v12 }
 0xf88   :  { %2584 = vmatmul.mubr.msk.f32.gmra.mrb[18].mxu0 %vm215_vm1, %v1080_v35 }
 0xf89   :  { %1208 = vmatprep.mubr.f32.mxu0 %v3179_v3  ;;  %2886 = vmatpush1.bf16.msra.mxu0 %v2885_v27  ;;  %v3821_v27 = vld [vmem:[%s4032_s9] ss:$0 sm:$0xff] }
 0xf8a   :  { %2888 = vmatprep.subr.bf16.mxu0 %v2887_v19  ;;  %v1523_v29 = vadd.f32 %v3821_v27, %v1513_v38 }
 0xf8c   :  { %2585 = vmatmul.mubr.msk.f32.gmra.mrb[20].mxu0 %vm215_vm1, %v1081_v22 }
 0xf8d   :  { %1214 = vmatprep.mubr.f32.mxu0 %v3179_v3  ;;  %2890 = vmatpush1.bf16.msra.mxu0 %v2889_v36 }
 0xf8e   :  { %2956 = vmatprep.subr.bf16.mxu0 %v3630_v32 }
 0xf90   :  { %2586 = vmatmul.mubr.msk.f32.gmra.mrb[22].mxu0 %vm215_vm1, %v1082_v42 }
 0xf91   :  { %1220 = vmatprep.mubr.f32.mxu0 %v3179_v3 }
 0xf94   :  { %2587 = vmatmul.mubr.msk.f32.gmra.mrb[24].mxu0 %vm215_vm1, %v1083_v23 }
 0xf95   :  { %1226 = vmatprep.mubr.f32.mxu0 %v3179_v3 }
 0xf98   :  { %2588 = vmatmul.mubr.msk.f32.gmra.mrb[26].mxu0 %vm215_vm1, %v1084_v43 }
 0xf99   :  { %1232 = vmatprep.mubr.f32.mxu0 %v3179_v3 }
 0xf9c   :  { %2589 = vmatmul.mubr.msk.f32.gmra.mrb[28].mxu0 %vm215_vm1, %v1085_v47 }
 0xf9d   :  { %1327 = vmatprep.mubr.f32.mxu0 %v3179_v3 }
 0xfa0   :  { %2590 = vmatmul.mubr.msk.f32.vlgmr.msra.gmra.mrb[14].mxu0 %vm215_vm1, %v1054_v59 }
 0xfa1   :  { %1333 = vmatprep.mubr.f32.mxu0 %v3179_v3  ;;  %2958 = vmatpush1.bf16.msra.mxu0 %v3638_v37 }
 0xfa2   :  { %2960 = vmatprep.subr.bf16.mxu0 %v3648_v40 }
 0xfa4   :  { %2591 = vmatmul.mubr.msk.f32.gmra.mrb[16].mxu0 %vm215_vm1, %v1055_v24 }
 0xfa5   :  { %1339 = vmatprep.mubr.f32.mxu0 %v3179_v3  ;;  %2962 = vmatpush1.bf16.msra.mxu0 %v3656_v45 }
 0xfa6   :  { %2964 = vmatprep.subr.bf16.mxu0 %v3666_v48 }
 0xfa8   :  { %2592 = vmatmul.mubr.msk.f32.gmra.mrb[18].mxu0 %vm215_vm1, %v1056_v25 }
 0xfa9   :  { %1345 = vmatprep.mubr.f32.mxu0 %v3179_v3  ;;  %2966 = vmatpush1.bf16.msra.mxu0 %v3674_v54 }
 0xfaa   :  { %2968 = vmatprep.subr.bf16.mxu0 %v3684_v57 }
 0xfac   :  { %2593 = vmatmul.mubr.msk.f32.gmra.mrb[20].mxu0 %vm215_vm1, %v1057_v26 }
 0xfad   :  { %1351 = vmatprep.mubr.f32.mxu0 %v3179_v3  ;;  %2970 = vmatpush1.bf16.msra.mxu0 %v3692_v61 }
 0xfae   :  { %2988 = vmatprep.subr.bf16.mxu0 %v3630_v32 }
 0xfb0   :  { %2594 = vmatmul.mubr.msk.f32.gmra.mrb[22].mxu0 %vm215_vm1, %v1058_v28 }
 0xfb1   :  { %1357 = vmatprep.mubr.f32.mxu0 %v3179_v3 }
 0xfb4   :  { %2595 = vmatmul.mubr.msk.f32.gmra.mrb[24].mxu0 %vm215_vm1, %v1059_v30 }
 0xfb5   :  { %1363 = vmatprep.mubr.f32.mxu0 %v3179_v3 }
 0xfb8   :  { %2596 = vmatmul.mubr.msk.f32.gmra.mrb[26].mxu0 %vm215_vm1, %v1060_v31 }
 0xfb9   :  { %1369 = vmatprep.mubr.f32.mxu0 %v3179_v3 }
 0xfbc   :  { %2597 = vmatmul.mubr.msk.f32.gmra.mrb[28].mxu0 %vm215_vm1, %v1061_v33 }
 0xfbd   :  { %1909 = vmatprep.mubr.f32.mxu0 %v3179_v3 }
0x1073   :  { %v1329_v46 = vpop.f32.mrb[14].mxu0 }
0x1074   :  { %v1388_v63 = vadd.f32 %v1381_v41, %v1329_v46  ;;  %v1331_v51 = vpop.f32.mrb[15].mxu0 }
0x1075   :  { %v1389_v21 = vadd.f32 %v1385_v44, %v1331_v51 }
0x1076   :  { %v1516_v55 = vadd.f32 %v1511_v34, %v1388_v63 }
0x1077   :  { %1405 = vst.msk [vmem:[#allocation2 + $0x8] sm:$0xff] %vm215_vm1, %v1389_v21  ;;  %v1335_v56 = vpop.f32.mrb[16].mxu0 }
0x1078   :  { %v3801_v58 = vadd.f32 %v1381_v41, %v1335_v56  ;;  %v1337_v60 = vpop.f32.mrb[17].mxu0  ;;  %v2599_v0 = vmul.f32 -1.442695, %v1516_v55 }
0x1079   :  { %v1391_v1 = vadd.f32 %v1385_v44, %v1337_v60 }
0x107a   :  { %3131 = vpow2.f32 %v2599_v0 }
0x107b   :  { %1407 = vst.msk [vmem:[#allocation2 + $0x18] sm:$0xff] %vm215_vm1, %v1391_v1  ;;  %v1341_v62 = vpop.f32.mrb[18].mxu0 }
0x107c   :  { %v3804_v5 = vadd.f32 %v1381_v41, %v1341_v62  ;;  %v1343_v49 = vpop.f32.mrb[19].mxu0 }
0x107d   :  { %v1393_v50 = vadd.f32 %v1385_v44, %v1343_v49 }
0x107e   :  { %v1444_v43 = vld [vmem:[#allocation2 + $0x8] sm:$0xff] }
0x107f   :  { %1409 = vst.msk [vmem:[#allocation2 + $0x28] sm:$0xff] %vm215_vm1, %v1393_v50  ;;  %v1347_v6 = vpop.f32.mrb[20].mxu0 }
0x1080   :  { %v3807_v7 = vadd.f32 %v1381_v41, %v1347_v6  ;;  %v1349_v8 = vpop.f32.mrb[21].mxu0 }
0x1081   :  { %v1395_v2 = vadd.f32 %v1385_v44, %v1349_v8 }
0x1082   :  { %v1541_v51 = vld [vmem:[#allocation2 + $0x18] sm:$0xff] }
0x1083   :  { %1411 = vst.msk [vmem:[#allocation2 + $0x38] sm:$0xff] %vm215_vm1, %v1395_v2  ;;  %v1353_v4 = vpop.f32.mrb[22].mxu0 }
0x1084   :  { %v3132_v9 = vpop.eup %3131  ;;  %v3810_v14 = vadd.f32 %v1381_v41, %v1353_v4  ;;  %v1355_v52 = vpop.f32.mrb[23].mxu0 }
0x1085   :  { %v1520_v10 = vadd.f32 1.0, %v3132_v9  ;;  %v1397_v11 = vadd.f32 %v1385_v44, %v1355_v52 }
0x1087   :  { %3133 = vrcp.f32 %v1520_v10  ;;  %1413 = vst.msk [vmem:[#allocation2 + $0x48] sm:$0xff] %vm215_vm1, %v1397_v11  ;;  %v1359_v53 = vpop.f32.mrb[24].mxu0  ;;  %v1641_v10 = vld [vmem:[#allocation2 + $0x28] sm:$0xff] }
0x1088   :  { %v3813_v12 = vadd.f32 %v1381_v41, %v1359_v53  ;;  %v1361_v13 = vpop.f32.mrb[25].mxu0 }
0x1089   :  { %v1399_v15 = vadd.f32 %v1385_v44, %v1361_v13 }
0x108b   :  { %1415 = vst.msk [vmem:[#allocation2 + $0x58] sm:$0xff] %vm215_vm1, %v1399_v15  ;;  %v1365_v16 = vpop.f32.mrb[26].mxu0 }
0x108c   :  { %v3816_v17 = vadd.f32 %v1381_v41, %v1365_v16  ;;  %v1367_v18 = vpop.f32.mrb[27].mxu0 }
0x108d   :  { %v1401_v19 = vadd.f32 %v1385_v44, %v1367_v18 }
0x108f   :  { %1417 = vst.msk [vmem:[#allocation2 + $0x68] sm:$0xff] %vm215_vm1, %v1401_v19  ;;  %v1371_v20 = vpop.f32.mrb[28].mxu0 }
0x1090   :  { %v3825_v35 = vadd.f32 %v1381_v41, %v1371_v20  ;;  %v1373_v36 = vpop.f32.mrb[29].mxu0 }
0x1091   :  { %v3134_v22 = vpop.eup %3133  ;;  %v1403_v42 = vadd.f32 %v1385_v44, %v1373_v36 }
0x1092   :  { %v1524_v23 = vmul.f32 %v3134_v22, %v1523_v29 }
0x1093   :  { %1419 = vst.msk [vmem:[#allocation2 + $0x78] sm:$0xff] %vm215_vm1, %v1403_v42 }
0x1094   :  { %v1525_v47 = vadd.f32 %v1524_v23, %v1444_v43 }
0x1096   :  { %3135 = vtanh.f32 %v1525_v47 }
0x10a0   :  { %v3136_v59 = vpop.eup %3135 }
0x10a1   :  { %v1527_v24 = vsub.f32 0.0, %v3136_v59 }
0x10a3   :  { %1529 = vrot.lane.b32.xlu0 %v1527_v24, %s3180_s24 }
0x1115   :  { %v1530_v25 = vpop.permute.xlu0 %1529 }
0x1116   :  { %v1532_v26 = vmul.f32 %v3134_v22, %v1530_v25 }
0x1118   :  { %1534 = vrot.lane.b32.xlu1 %v1532_v26, %s3180_s24 }
0x118a   :  { %v1535_v28 = vpop.permute.xlu1 %1534 }
0x118b   :  { %v1537_v30 = vadd.f32 %v3136_v59, %v1535_v28  ;;  %v1741_v59 = vld [vmem:[#allocation2 + $0x38] sm:$0xff] }
0x118d   :  { %1538 = vst.msk [vmem:[#allocation3] sm:$0xff] %vm215_vm1, %v1537_v30  ;;  %1539 = vst.msk [vmem:[#allocation4 + $0x38] sm:$0xff] %vm215_vm1, %v1537_v30  ;;  %2600 = vmatmul.mubr.msk.f32.vlgmr.msra.gmra.mrb[20].mxu1 %vm215_vm1, %v1537_v30 }
0x118e   :  { %2926 = vmatpush1.bf16.msra.mxu1 %v3638_v37  ;;  %1709 = vmatprep.mubr.f32.mxu1 %v3179_v3 }
0x118f   :  { %2928 = vmatprep.subr.bf16.mxu1 %v3648_v40 }
0x1192   :  { %2930 = vmatpush1.bf16.msra.mxu1 %v3656_v45 }
0x1193   :  { %2932 = vmatprep.subr.bf16.mxu1 %v3666_v48 }
0x1196   :  { %2934 = vmatpush1.bf16.msra.mxu1 %v3674_v54 }
0x1197   :  { %2936 = vmatprep.subr.bf16.mxu1 %v3684_v57 }
0x119a   :  { %2938 = vmatpush1.bf16.msra.mxu1 %v3692_v61 }
0x119b   :  { %2940 = vmatprep.subr.bf16.mxu1 %v3630_v32 }
0x1260   :  { %v1611_v31 = vpop.f32.mrb[20].mxu1 }
0x1261   :  { %v1616_v33 = vadd.f32 %v1611_v31, %v3801_v58  ;;  %v1613_v34 = vpop.f32.mrb[21].mxu1 }
0x1262   :  { %v1623_v44 = vadd.f32 %v3821_v27, %v1613_v34 }
0x1263   :  { %v2601_v38 = vmul.f32 -1.442695, %v1616_v33 }
0x1265   :  { %3137 = vpow2.f32 %v2601_v38 }
0x126f   :  { %v3138_v39 = vpop.eup %3137 }
0x1270   :  { %v1620_v41 = vadd.f32 1.0, %v3138_v39 }
0x1272   :  { %3139 = vrcp.f32 %v1620_v41 }
0x127c   :  { %v3140_v46 = vpop.eup %3139 }
0x127d   :  { %v1624_v63 = vmul.f32 %v3140_v46, %v1623_v44 }
0x127f   :  { %v1625_v21 = vadd.f32 %v1624_v63, %v1541_v51  ;;  %v1841_v51 = vld [vmem:[#allocation2 + $0x48] sm:$0xff] }
0x1281   :  { %3141 = vtanh.f32 %v1625_v21 }
0x128b   :  { %v3142_v55 = vpop.eup %3141 }
0x128c   :  { %v1627_v56 = vsub.f32 %v1537_v30, %v3142_v55 }
0x128e   :  { %1629 = vrot.lane.b32.xlu0 %v1627_v56, %s3180_s24 }
0x1300   :  { %v1630_v60 = vpop.permute.xlu0 %1629 }
0x1301   :  { %v1632_v0 = vmul.f32 %v3140_v46, %v1630_v60 }
0x1303   :  { %1634 = vrot.lane.b32.xlu1 %v1632_v0, %s3180_s24 }
0x1375   :  { %v1635_v58 = vpop.permute.xlu1 %1634 }
0x1376   :  { %v1637_v1 = vadd.f32 %v3142_v55, %v1635_v58 }
0x1378   :  { %1638 = vst.msk [vmem:[#allocation3 + $0x8] sm:$0xff] %vm215_vm1, %v1637_v1  ;;  %1639 = vst.msk [vmem:[#allocation4 + $0x30] sm:$0xff] %vm215_vm1, %v1637_v1  ;;  %2602 = vmatmul.mubr.msk.f32.vlgmr.msra.gmra.mrb[22].mxu1 %vm215_vm1, %v1637_v1 }
0x1379   :  { %2942 = vmatpush1.bf16.msra.mxu1 %v3638_v37  ;;  %1809 = vmatprep.mubr.f32.mxu1 %v3179_v3 }
0x137a   :  { %2944 = vmatprep.subr.bf16.mxu1 %v3648_v40 }
0x137d   :  { %2946 = vmatpush1.bf16.msra.mxu1 %v3656_v45 }
0x137e   :  { %2948 = vmatprep.subr.bf16.mxu1 %v3666_v48 }
0x1381   :  { %2950 = vmatpush1.bf16.msra.mxu1 %v3674_v54 }
0x1382   :  { %2952 = vmatprep.subr.bf16.mxu1 %v3684_v57 }
0x1385   :  { %2954 = vmatpush1.bf16.msra.mxu1 %v3692_v61 }
0x1386   :  { %2972 = vmatprep.subr.bf16.mxu1 %v3630_v32 }
0x144b   :  { %v1711_v62 = vpop.f32.mrb[22].mxu1 }
0x144c   :  { %v1716_v49 = vadd.f32 %v1711_v62, %v3804_v5  ;;  %v1713_v50 = vpop.f32.mrb[23].mxu1 }
0x144d   :  { %v1723_v4 = vadd.f32 %v3821_v27, %v1713_v50 }
0x144e   :  { %v2603_v6 = vmul.f32 -1.442695, %v1716_v49 }
0x1450   :  { %3143 = vpow2.f32 %v2603_v6 }
0x145a   :  { %v3144_v8 = vpop.eup %3143 }
0x145b   :  { %v1720_v2 = vadd.f32 1.0, %v3144_v8 }
0x145d   :  { %3145 = vrcp.f32 %v1720_v2 }
0x1467   :  { %v3146_v9 = vpop.eup %3145 }
0x1468   :  { %v1724_v52 = vmul.f32 %v3146_v9, %v1723_v4 }
0x146a   :  { %v1725_v11 = vadd.f32 %v1724_v52, %v1641_v10 }
0x146c   :  { %3147 = vtanh.f32 %v1725_v11 }
0x1476   :  { %v3148_v53 = vpop.eup %3147 }
0x1477   :  { %v1727_v13 = vsub.f32 %v1637_v1, %v3148_v53 }
0x1479   :  { %1729 = vrot.lane.b32.xlu0 %v1727_v13, %s3180_s24 }
0x14eb   :  { %v1730_v15 = vpop.permute.xlu0 %1729 }
0x14ec   :  { %v1732_v16 = vmul.f32 %v3146_v9, %v1730_v15 }
0x14ee   :  { %1734 = vrot.lane.b32.xlu1 %v1732_v16, %s3180_s24 }
0x1560   :  { %v1735_v5 = vpop.permute.xlu1 %1734 }
0x1561   :  { %v1737_v18 = vadd.f32 %v3148_v53, %v1735_v5 }
0x1563   :  { %1738 = vst.msk [vmem:[#allocation3 + $0x10] sm:$0xff] %vm215_vm1, %v1737_v18  ;;  %1739 = vst.msk [vmem:[#allocation4 + $0x28] sm:$0xff] %vm215_vm1, %v1737_v18  ;;  %2604 = vmatmul.mubr.msk.f32.vlgmr.msra.gmra.mrb[24].mxu1 %vm215_vm1, %v1737_v18 }
0x1564   :  { %2974 = vmatpush1.bf16.msra.mxu1 %v3638_v37  ;;  %2009 = vmatprep.mubr.f32.mxu1 %v3179_v3 }
0x1565   :  { %2976 = vmatprep.subr.bf16.mxu1 %v3648_v40 }
0x1568   :  { %2978 = vmatpush1.bf16.msra.mxu1 %v3656_v45 }
0x1569   :  { %2980 = vmatprep.subr.bf16.mxu1 %v3666_v48 }
0x156c   :  { %2982 = vmatpush1.bf16.msra.mxu1 %v3674_v54 }
0x156d   :  { %2984 = vmatprep.subr.bf16.mxu1 %v3684_v57 }
0x1570   :  { %2986 = vmatpush1.bf16.msra.mxu1 %v3692_v61 }
0x1571   :  { %3004 = vmatprep.subr.bf16.mxu1 %v3630_v32 }
0x1636   :  { %v1811_v19 = vpop.f32.mrb[24].mxu1 }
0x1637   :  { %v1816_v20 = vadd.f32 %v1811_v19, %v3807_v7  ;;  %v1813_v29 = vpop.f32.mrb[25].mxu1 }
0x1638   :  { %v1823_v23 = vadd.f32 %v3821_v27, %v1813_v29 }
0x1639   :  { %v2605_v36 = vmul.f32 -1.442695, %v1816_v20 }
0x163b   :  { %3149 = vpow2.f32 %v2605_v36 }
0x1645   :  { %v3150_v22 = vpop.eup %3149 }
0x1646   :  { %v1820_v42 = vadd.f32 1.0, %v3150_v22 }
0x1648   :  { %3151 = vrcp.f32 %v1820_v42 }
0x1652   :  { %v3152_v43 = vpop.eup %3151 }
0x1653   :  { %v1824_v47 = vmul.f32 %v3152_v43, %v1823_v23 }
0x1655   :  { %v1825_v24 = vadd.f32 %v1824_v47, %v1741_v59 }
0x1657   :  { %3153 = vtanh.f32 %v1825_v24 }
0x1661   :  { %v3154_v25 = vpop.eup %3153 }
0x1662   :  { %v1827_v26 = vsub.f32 %v1737_v18, %v3154_v25  ;;  %v2041_v18 = vld [vmem:[#allocation2 + $0x68] sm:$0xff] }
0x1664   :  { %1829 = vrot.lane.b32.xlu0 %v1827_v26, %s3180_s24 }
0x16d6   :  { %v1830_v32 = vpop.permute.xlu0 %1829 }
0x16d7   :  { %v1832_v28 = vmul.f32 %v3152_v43, %v1830_v32 }
0x16d9   :  { %1834 = vrot.lane.b32.xlu1 %v1832_v28, %s3180_s24 }
0x174b   :  { %v1835_v7 = vpop.permute.xlu1 %1834 }
0x174c   :  { %v1837_v30 = vadd.f32 %v3154_v25, %v1835_v7  ;;  %v2141_v7 = vld [vmem:[#allocation2 + $0x78] sm:$0xff] }
0x174e   :  { %1838 = vst.msk [vmem:[#allocation3 + $0x18] sm:$0xff] %vm215_vm1, %v1837_v30  ;;  %1839 = vst.msk [vmem:[#allocation4 + $0x20] sm:$0xff] %vm215_vm1, %v1837_v30  ;;  %2606 = vmatmul.mubr.msk.f32.vlgmr.msra.gmra.mrb[30].mxu0 %vm215_vm1, %v1837_v30 }
0x174f   :  { %2990 = vmatpush1.bf16.msra.mxu0 %v3638_v37  ;;  %2109 = vmatprep.mubr.f32.mxu0 %v3179_v3 }
0x1750   :  { %2992 = vmatprep.subr.bf16.mxu0 %v3648_v40 }
0x1753   :  { %2994 = vmatpush1.bf16.msra.mxu0 %v3656_v45 }
0x1754   :  { %2996 = vmatprep.subr.bf16.mxu0 %v3666_v48 }
0x1757   :  { %2998 = vmatpush1.bf16.msra.mxu0 %v3674_v54 }
0x1758   :  { %3000 = vmatprep.subr.bf16.mxu0 %v3684_v57 }
0x175b   :  { %3002 = vmatpush1.bf16.msra.mxu0 %v3692_v61 }
0x1821   :  { %v1911_v31 = vpop.f32.mrb[30].mxu0 }
0x1822   :  { %v1916_v33 = vadd.f32 %v1911_v31, %v3810_v14  ;;  %v1913_v34 = vpop.f32.mrb[31].mxu0  ;;  %v2264_v31 = vld [vmem:[%s4033_s11] sm:$0xff] }
0x1823   :  { %v1923_v44 = vadd.f32 %v3821_v27, %v1913_v34 }
0x1824   :  { %v2607_v38 = vmul.f32 -1.442695, %v1916_v33  ;;  %v2266_v33 = vld [vmem:[%s4033_s11 + $0x10] sm:$0xff] }
0x1826   :  { %3155 = vpow2.f32 %v2607_v38 }
0x1830   :  { %v3156_v39 = vpop.eup %3155 }
0x1831   :  { %v1920_v41 = vadd.f32 1.0, %v3156_v39 }
0x1833   :  { %3157 = vrcp.f32 %v1920_v41 }
0x183d   :  { %v3158_v46 = vpop.eup %3157 }
0x183e   :  { %v1924_v63 = vmul.f32 %v3158_v46, %v1923_v44  ;;  %v2268_v44 = vld [vmem:[%s4033_s11 + $0x20] sm:$0xff] }
0x1840   :  { %v1925_v21 = vadd.f32 %v1924_v63, %v1841_v51  ;;  %v2270_v51 = vld [vmem:[%s4033_s11 + $0x30] sm:$0xff] }
0x1842   :  { %3159 = vtanh.f32 %v1925_v21  ;;  %v2271_v21 = vld [vmem:[%s4033_s11 + $0x38] sm:$0xff] }
0x184c   :  { %v3160_v55 = vpop.eup %3159 }
0x184d   :  { %v1927_v56 = vsub.f32 %v1837_v30, %v3160_v55 }
0x184f   :  { %1929 = vrot.lane.b32.xlu0 %v1927_v56, %s3180_s24  ;;  %v2248_v56 = vld [vmem:[%s4034_s10] sm:$0xff] }
0x18c1   :  { %v1930_v60 = vpop.permute.xlu0 %1929 }
0x18c2   :  { %v1932_v0 = vmul.f32 %v3158_v46, %v1930_v60  ;;  %v2269_v46 = vld [vmem:[%s4033_s11 + $0x28] sm:$0xff] }
0x18c3   :  { %v3027_v63 = vpack.c.bf16 %v2269_v46, %v2268_v44  ;;  %v2249_v60 = vld [vmem:[%s4034_s10 + $0x8] sm:$0xff] }
0x18c4   :  { %1934 = vrot.lane.b32.xlu1 %v1932_v0, %s3180_s24  ;;  %v3035_v0 = vpack.c.bf16 %v2249_v60, %v2248_v56 }
0x1936   :  { %v1935_v14 = vpop.permute.xlu1 %1934 }
0x1937   :  { %v1937_v58 = vadd.f32 %v3160_v55, %v1935_v14  ;;  %v3031_v55 = vpack.c.bf16 %v2271_v21, %v2270_v51 }
0x1939   :  { %1938 = vst.msk [vmem:[#allocation3 + $0x20] sm:$0xff] %vm215_vm1, %v1937_v58  ;;  %1939 = vst.msk [vmem:[#allocation4 + $0x18] sm:$0xff] %vm215_vm1, %v1937_v58  ;;  %2608 = vmatmul.mubr.msk.f32.vlgmr.msra.gmra.mrb[26].mxu1 %vm215_vm1, %v1937_v58 }
0x193a   :  { %3006 = vmatpush1.bf16.msra.mxu1 %v3638_v37  ;;  %2209 = vmatprep.mubr.f32.mxu1 %v3179_v3 }
0x193b   :  { %3008 = vmatprep.subr.bf16.mxu1 %v3648_v40 }
0x193e   :  { %3010 = vmatpush1.bf16.msra.mxu1 %v3656_v45 }
0x193f   :  { %3012 = vmatprep.subr.bf16.mxu1 %v3666_v48  ;;  %v1941_v48 = vld [vmem:[#allocation2 + $0x58] sm:$0xff] }
0x1942   :  { %3014 = vmatpush1.bf16.msra.mxu1 %v3674_v54 }
0x1943   :  { %3016 = vmatprep.subr.bf16.mxu1 %v3684_v57 }
0x1946   :  { %3018 = vmatpush1.bf16.msra.mxu1 %v3692_v61 }
0x1a0c   :  { %v2011_v1 = vpop.f32.mrb[26].mxu1 }
0x1a0d   :  { %v2016_v62 = vadd.f32 %v2011_v1, %v3813_v12  ;;  %v2013_v49 = vpop.f32.mrb[27].mxu1 }
0x1a0e   :  { %v2023_v40 = vadd.f32 %v3821_v27, %v2013_v49  ;;  %v2250_v49 = vld [vmem:[%s4034_s10 + $0x10] sm:$0xff] }
0x1a0f   :  { %v2609_v50 = vmul.f32 -1.442695, %v2016_v62 }
0x1a11   :  { %3161 = vpow2.f32 %v2609_v50  ;;  %v2251_v50 = vld [vmem:[%s4034_s10 + $0x18] sm:$0xff] }
0x1a1b   :  { %v3162_v37 = vpop.eup %3161 }
0x1a1c   :  { %v2020_v3 = vadd.f32 1.0, %v3162_v37 }
0x1a1e   :  { %3163 = vrcp.f32 %v2020_v3  ;;  %v3039_v3 = vpack.c.bf16 %v2251_v50, %v2250_v49 }
0x1a28   :  { %v3164_v45 = vpop.eup %3163 }
0x1a29   :  { %v2024_v6 = vmul.f32 %v3164_v45, %v2023_v40 }
0x1a2b   :  { %v2025_v8 = vadd.f32 %v2024_v6, %v1941_v48  ;;  %v2253_v6 = vld [vmem:[%s4034_s10 + $0x28] sm:$0xff] }
0x1a2d   :  { %3165 = vtanh.f32 %v2025_v8 }
0x1a37   :  { %v3166_v54 = vpop.eup %3165 }
0x1a38   :  { %v2027_v57 = vsub.f32 %v1937_v58, %v3166_v54 }
0x1a3a   :  { %2029 = vrot.lane.b32.xlu0 %v2027_v57, %s3180_s24  ;;  %v2254_v57 = vld [vmem:[%s4034_s10 + $0x30] sm:$0xff] }
0x1aac   :  { %v2030_v61 = vpop.permute.xlu0 %2029 }
0x1aad   :  { %v2032_v2 = vmul.f32 %v3164_v45, %v2030_v61  ;;  %v2252_v45 = vld [vmem:[%s4034_s10 + $0x20] sm:$0xff]  ;;  %v2255_v61 = vld [vmem:[%s4034_s10 + $0x38] sm:$0xff] }
0x1aae   :  { %v3043_v8 = vpack.c.bf16 %v2253_v6, %v2252_v45 }
0x1aaf   :  { %2034 = vrot.lane.b32.xlu1 %v2032_v2, %s3180_s24  ;;  %v2260_v2 = vld [vmem:[#allocation4 + $0x20] sm:$0xff] }
0x1b21   :  { %v2035_v12 = vpop.permute.xlu1 %2034 }
0x1b22   :  { %v2037_v4 = vadd.f32 %v3166_v54, %v2035_v12  ;;  %v2259_v54 = vld [vmem:[#allocation4 + $0x18] sm:$0xff]  ;;  %v3047_v12 = vpack.c.bf16 %v2255_v61, %v2254_v57 }
0x1b24   :  { %2038 = vst.msk [vmem:[#allocation3 + $0x28] sm:$0xff] %vm215_vm1, %v2037_v4  ;;  %2039 = vst.msk [vmem:[#allocation4 + $0x10] sm:$0xff] %vm215_vm1, %v2037_v4  ;;  %2610 = vmatmul.mubr.msk.f32.vlgmr.msra.gmra.mrb[32].mxu0 %vm215_vm1, %v2037_v4 }
0x1b2b   :  { %v2258_v48 = vld [vmem:[#allocation4 + $0x10] sm:$0xff] }
0x1bf7   :  { %v2111_v9 = vpop.f32.mrb[32].mxu0 }
0x1bf8   :  { %v2116_v52 = vadd.f32 %v2111_v9, %v3816_v17  ;;  %v2113_v10 = vpop.f32.mrb[33].mxu0  ;;  %v2262_v9 = vld [vmem:[#allocation4 + $0x30] sm:$0xff] }
0x1bf9   :  { %v2123_v15 = vadd.f32 %v3821_v27, %v2113_v10  ;;  %v2240_v10 = vld [vmem:[#allocation3] sm:$0xff] }
0x1bfa   :  { %v2611_v11 = vmul.f32 -1.442695, %v2116_v52  ;;  %v2263_v52 = vld [vmem:[#allocation4 + $0x38] sm:$0xff] }
0x1bfc   :  { %3167 = vpow2.f32 %v2611_v11  ;;  %v2241_v11 = vld [vmem:[#allocation3 + $0x8] sm:$0xff] }
0x1c06   :  { %v3168_v53 = vpop.eup %3167 }
0x1c07   :  { %v2120_v13 = vadd.f32 1.0, %v3168_v53  ;;  %v2242_v53 = vld [vmem:[#allocation3 + $0x10] sm:$0xff] }
0x1c09   :  { %3169 = vrcp.f32 %v2120_v13  ;;  %v2243_v13 = vld [vmem:[#allocation3 + $0x18] sm:$0xff] }
0x1c13   :  { %v3170_v16 = vpop.eup %3169 }
0x1c14   :  { %v2124_v5 = vmul.f32 %v3170_v16, %v2123_v15  ;;  %v2244_v15 = vld [vmem:[#allocation3 + $0x20] sm:$0xff] }
0x1c16   :  { %v2125_v19 = vadd.f32 %v2124_v5, %v2041_v18 }
0x1c18   :  { %3171 = vtanh.f32 %v2125_v19  ;;  %v2630_v19 = vld [vmem:[%s4035_s12] ss:$0 sm:$0xff] }
0x1c22   :  { %v3172_v20 = vpop.eup %3171 }
0x1c23   :  { %v2127_v29 = vsub.f32 %v2037_v4, %v3172_v20  ;;  %v2261_v4 = vld [vmem:[#allocation4 + $0x28] sm:$0xff] }
0x1c25   :  { %2129 = vrot.lane.b32.xlu0 %v2127_v29, %s3180_s24 }
0x1c97   :  { %v2130_v36 = vpop.permute.xlu0 %2129 }
0x1c98   :  { %v2132_v22 = vmul.f32 %v3170_v16, %v2130_v36  ;;  %v2245_v16 = vld [vmem:[#allocation3 + $0x28] sm:$0xff] }
0x1c9a   :  { %2134 = vrot.lane.b32.xlu1 %v2132_v22, %s3180_s24 }
0x1d0c   :  { %v2135_v17 = vpop.permute.xlu1 %2134 }
0x1d0d   :  { %v2137_v42 = vadd.f32 %v3172_v20, %v2135_v17 }
0x1d0f   :  { %2138 = vst.msk [vmem:[#allocation3 + $0x30] sm:$0xff] %vm215_vm1, %v2137_v42  ;;  %2139 = vst.msk [vmem:[#allocation4 + $0x8] sm:$0xff] %vm215_vm1, %v2137_v42  ;;  %2612 = vmatmul.mubr.msk.f32.vlgmr.msra.gmra.mrb[28].mxu1 %vm215_vm1, %v2137_v42 }
0x1d16   :  { %v2257_v40 = vld [vmem:[#allocation4 + $0x8] sm:$0xff]  ;;  %v2246_v5 = vld [vmem:[#allocation3 + $0x30] sm:$0xff] }
0x1de2   :  { %v2211_v23 = vpop.f32.mrb[28].mxu1 }
0x1de3   :  { %v2216_v43 = vadd.f32 %v2211_v23, %v3825_v35  ;;  %v2213_v47 = vpop.f32.mrb[29].mxu1  ;;  %v2265_v35 = vld [vmem:[%s4033_s11 + $0x8] sm:$0xff] }
0x1de4   :  { %v2223_v26 = vadd.f32 %v3821_v27, %v2213_v47  ;;  %v3019_v34 = vpack.c.bf16 %v2265_v35, %v2264_v31  ;;  %v2267_v27 = vld [vmem:[%s4033_s11 + $0x18] sm:$0xff] }
0x1de5   :  { %v2613_v59 = vmul.f32 -1.442695, %v2216_v43  ;;  %v3023_v38 = vpack.c.bf16 %v2267_v27, %v2266_v33 }
0x1de6   :  { %3020 = vmatprep.subr.bf16.mxu0 %v3019_v34 }
0x1de7   :  { %3173 = vpow2.f32 %v2613_v59  ;;  %3022 = vmatpush3.bf16.msra.mxu0 %v3019_v34 }
0x1de8   :  { %3024 = vmatprep.subr.bf16.mxu0 %v3023_v38 }
0x1deb   :  { %3026 = vmatpush3.bf16.msra.mxu0 %v3023_v38 }
0x1dec   :  { %3028 = vmatprep.subr.bf16.mxu0 %v3027_v63 }
0x1def   :  { %3030 = vmatpush3.bf16.msra.mxu0 %v3027_v63 }
0x1df0   :  { %3032 = vmatprep.subr.bf16.mxu0 %v3031_v55 }
0x1df1   :  { %v3174_v24 = vpop.eup %3173 }
0x1df2   :  { %v2220_v25 = vadd.f32 1.0, %v3174_v24 }
0x1df3   :  { %3034 = vmatpush3.bf16.msra.mxu0 %v3031_v55 }
0x1df4   :  { %3175 = vrcp.f32 %v2220_v25  ;;  %3036 = vmatprep.subr.bf16.mxu0 %v3035_v0 }
0x1dfe   :  { %v3176_v32 = vpop.eup %3175 }
0x1dff   :  { %v2224_v28 = vmul.f32 %v3176_v32, %v2223_v26 }
0x1e01   :  { %v2225_v30 = vadd.f32 %v2224_v28, %v2141_v7 }
0x1e03   :  { %3177 = vtanh.f32 %v2225_v30 }
0x1e0d   :  { %v3178_v39 = vpop.eup %3177 }
0x1e0e   :  { %v2227_v41 = vsub.f32 %v2137_v42, %v3178_v39 }
0x1e10   :  { %2229 = vrot.lane.b32.xlu0 %v2227_v41, %s3180_s24 }
0x1e82   :  { %v2230_v14 = vpop.permute.xlu0 %2229 }
0x1e83   :  { %v2232_v58 = vmul.f32 %v3176_v32, %v2230_v14 }
0x1e85   :  { %2234 = vrot.lane.b32.xlu1 %v2232_v58, %s3180_s24 }
0x1ef7   :  { %v2235_v1 = vpop.permute.xlu1 %2234 }
0x1ef8   :  { %v2237_v62 = vadd.f32 %v3178_v39, %v2235_v1 }
0x1efa   :  { %2238 = vst.msk [vmem:[#allocation3 + $0x38] sm:$0xff] %vm215_vm1, %v2237_v62  ;;  %2239 = vst.msk [vmem:[#allocation4] sm:$0xff] %vm215_vm1, %v2237_v62 }
0x1f01   :  { %v2256_v37 = vld [vmem:[#allocation4] sm:$0xff]  ;;  %v2247_v18 = vld [vmem:[#allocation3 + $0x38] sm:$0xff] }
0x1f02   :  { %2679 = vmatprep.mubr.msk.f32.mxu0 %vm215_vm1, %v2256_v37 }
0x1f03   :  { %2680 = vmatmul.mubr.msk.f32.vlgmr.msra.gmra.mrb[34].mxu0 %vm215_vm1, %v2257_v40 }
0x1f04   :  { %2682 = vmatprep.mubr.msk.f32.mxu0 %vm215_vm1, %v2258_v48  ;;  %3038 = vmatpush3.bf16.msra.mxu0 %v3035_v0 }
0x1f05   :  { %3040 = vmatprep.subr.bf16.mxu0 %v3039_v3 }
0x1f07   :  { %2683 = vmatmul.mubr.msk.f32.gmra.mrb[36].mxu0 %vm215_vm1, %v2259_v54 }
0x1f08   :  { %2685 = vmatprep.mubr.msk.f32.mxu0 %vm215_vm1, %v2260_v2  ;;  %3042 = vmatpush3.bf16.msra.mxu0 %v3039_v3 }
0x1f09   :  { %3044 = vmatprep.subr.bf16.mxu0 %v3043_v8 }
0x1f0b   :  { %2686 = vmatmul.mubr.msk.f32.gmra.mrb[38].mxu0 %vm215_vm1, %v2261_v4 }
0x1f0c   :  { %2688 = vmatprep.mubr.msk.f32.mxu0 %vm215_vm1, %v2262_v9  ;;  %3046 = vmatpush3.bf16.msra.mxu0 %v3043_v8 }
0x1f0d   :  { %3048 = vmatprep.subr.bf16.mxu0 %v3047_v12 }
0x1f0f   :  { %2689 = vmatmul.mubr.msk.f32.gmra.mrb[40].mxu0 %vm215_vm1, %v2263_v52 }
0x1f10   :  { %3050 = vmatpush3.bf16.msra.mxu0 %v3047_v12  ;;  %2707 = vmatprep.mubr.msk.f32.mxu0 %vm215_vm1, %v2240_v10 }
0x1f13   :  { %2708 = vmatmul.mubr.msk.f32.vlgmr.msra.gmra.mrb[34].mxu0 %vm215_vm1, %v2241_v11 }
0x1f14   :  { %2710 = vmatprep.mubr.msk.f32.mxu0 %vm215_vm1, %v2242_v53 }
0x1f17   :  { %2711 = vmatmul.mubr.msk.f32.gmra.mrb[36].mxu0 %vm215_vm1, %v2243_v13 }
0x1f18   :  { %2713 = vmatprep.mubr.msk.f32.mxu0 %vm215_vm1, %v2244_v15 }
0x1f1b   :  { %2714 = vmatmul.mubr.msk.f32.gmra.mrb[38].mxu0 %vm215_vm1, %v2245_v16 }
0x1f1c   :  { %2716 = vmatprep.mubr.msk.f32.mxu0 %vm215_vm1, %v2246_v5 }
0x1f1f   :  { %2717 = vmatmul.mubr.msk.f32.gmra.mrb[40].mxu0 %vm215_vm1, %v2247_v18 }
0x1fe6   :  { %v2709_v20 = vpop.f32.mrb[34].mxu0 }
0x1fe7   :  { %v2538_v29 = vadd.f32 %v2709_v20, %v2630_v19  ;;  %v2491_v36 = vpop.f32.mrb[35].mxu0 }
0x1fe8   :  { %v2537_v22 = vadd.f32 %v2630_v19, %v2491_v36 }
0x1fe9   :  { %2547 = vst.msk [vmem:[%s4036_s13 + $0x8] sm:$0xff] %vm2545_vm2, %v2538_v29 }
0x1fea   :  { %2546 = vst.msk [vmem:[%s4036_s13] sm:$0xff] %vm2545_vm2, %v2537_v22  ;;  %v2712_v17 = vpop.f32.mrb[36].mxu0 }
0x1feb   :  { %v2540_v42 = vadd.f32 %v2712_v17, %v2630_v19  ;;  %v2501_v23 = vpop.f32.mrb[37].mxu0 }
0x1fec   :  { %v2539_v43 = vadd.f32 %v2630_v19, %v2501_v23 }
0x1fed   :  { %2549 = vst.msk [vmem:[%s4036_s13 + $0x18] sm:$0xff] %vm2545_vm2, %v2540_v42 }
0x1fee   :  { %2548 = vst.msk [vmem:[%s4036_s13 + $0x10] sm:$0xff] %vm2545_vm2, %v2539_v43  ;;  %v2715_v47 = vpop.f32.mrb[38].mxu0 }
0x1fef   :  { %v2542_v59 = vadd.f32 %v2715_v47, %v2630_v19  ;;  %v2511_v24 = vpop.f32.mrb[39].mxu0 }
0x1ff0   :  { %v2541_v25 = vadd.f32 %v2630_v19, %v2511_v24 }
0x1ff1   :  { %2551 = vst.msk [vmem:[%s4036_s13 + $0x28] sm:$0xff] %vm2545_vm2, %v2542_v59 }
0x1ff2   :  { %2550 = vst.msk [vmem:[%s4036_s13 + $0x20] sm:$0xff] %vm2545_vm2, %v2541_v25  ;;  %v2718_v26 = vpop.f32.mrb[40].mxu0 }
0x1ff3   :  { %v2544_v32 = vadd.f32 %v2718_v26, %v2630_v19  ;;  %v2521_v28 = vpop.f32.mrb[41].mxu0 }
0x1ff4   :  { %v2543_v7 = vadd.f32 %v2630_v19, %v2521_v28 }
0x1ff5   :  { %2553 = vst.msk [vmem:[%s4036_s13 + $0x38] sm:$0xff] %vm2545_vm2, %v2544_v32 }
0x1ff6   :  { %2552 = vst.msk [vmem:[%s4036_s13 + $0x30] sm:$0xff] %vm2545_vm2, %v2543_v7 }

</bundles_post_ra>
